<compile_context>
chip_gen: v7x
topology: tpu7x:2x2x1
jax: 0.10.0
libtpu: 0.0.40
codegen_flags: <defaults>
</compile_context>

<pallas_src>
import math
import jax
import jax.numpy as jnp
from jax.experimental import pallas as pl
from jax.experimental.pallas import tpu as pltpu

INPUT_DIM = 28 * 28  # 784

# --- packed-bias layout (lane-aligned offsets inside one (1, 1792) buffer) ---
_BE1_OFF, _BE1_N = 0,    256
_BD2_OFF, _BD2_N = 256,  256
_BD3_OFF, _BD3_N = 512,  INPUT_DIM          # 512..1296
_BE2_OFF, _BE2_N = 1408, 32
_BE3_OFF, _BE3_N = 1536, 4
_BD1_OFF, _BD1_N = 1664, 32
_BIAS_TOTAL = 1792


def _vae_fwd_kernel(
    x_ref, eps_ref,
    we1_ref, we2_ref, we3_ref,
    wd1_ref, wd2_ref, wd3_ref,
    bias_ref,
    xrec_ref, mulv_ref,
):
    be1 = bias_ref[:, _BE1_OFF:_BE1_OFF + _BE1_N]
    be2 = bias_ref[:, _BE2_OFF:_BE2_OFF + _BE2_N]
    be3 = bias_ref[:, _BE3_OFF:_BE3_OFF + _BE3_N]
    bd1 = bias_ref[:, _BD1_OFF:_BD1_OFF + _BD1_N]
    bd2 = bias_ref[:, _BD2_OFF:_BD2_OFF + _BD2_N]
    bd3 = bias_ref[:, _BD3_OFF:_BD3_OFF + _BD3_N]

    x = x_ref[...]                                            # (TB, 784) bf16

    # ----- encoder -----
    # Dominant GEMM #1: bf16 operands, f32 accumulation on the MXU.
    h = jnp.dot(x, we1_ref[...], preferred_element_type=jnp.float32) + be1
    h = jnp.maximum(h, 0.0)                                   # ReLU, (TB, 256) f32
    h = jnp.dot(h.astype(jnp.bfloat16), we2_ref[...],
                preferred_element_type=jnp.float32) + be2
    h = jnp.maximum(h, 0.0)                                   # ReLU, (TB, 32)
    h = jnp.dot(h, we3_ref[...],
                preferred_element_type=jnp.float32) + be3     # (TB, 4)
    # we3/be3 columns were permuted in the wrapper to [0,2,1,3] so that:
    mu = h[:, 0:2]                                            # == torch h[:, 0::2]
    log_var = h[:, 2:4]                                       # == torch h[:, 1::2]

    # ----- reparameterization (eps == 0 reproduces the eval branch z = mu) ---
    z = mu + eps_ref[...] * jnp.exp(0.5 * log_var)            # (TB, 2) f32

    # ----- decoder -----
    # K=2 layer: keep it off the MXU — two broadcast FMAs on the VPU.
    d = (z[:, 0:1] * wd1_ref[0:1, :]
         + z[:, 1:2] * wd1_ref[1:2, :]
         + bd1)                                               # (TB, 32)
    d = jnp.maximum(d, 0.0)
    d = jnp.dot(d.astype(jnp.bfloat16), wd2_ref[...],
                preferred_element_type=jnp.float32) + bd2
    d = jnp.maximum(d, 0.0)                                   # (TB, 256)
    # Dominant GEMM #2: bf16 operands, f32 accumulation.
    d = jnp.dot(d.astype(jnp.bfloat16), wd3_ref[...],
                preferred_element_type=jnp.float32) + bd3     # (TB, 784) f32

    # sigmoid(d) == 0.5 * tanh(0.5 * d) + 0.5 : one EUP transcendental/elem.
    xrec_ref[...] = (0.5 * jnp.tanh(0.5 * d) + 0.5).astype(xrec_ref.dtype)
    mulv_ref[...] = h                                         # (TB, 4) = [mu | log_var]


def _round_up(a, m):
    return (a + m - 1) // m * m


def _cdiv(a, b):
    return (a + b - 1) // b


def _choose_block_b(B):
    """Batch-tile heuristic: >= 4 pipelined grid steps (2 per v7x TC) when the
    batch allows 16-row tiles, minimal padding, tile capped at 1024 rows so
    double-buffered bf16 (TB, 784) x / x_rec tiles + ~1 MiB resident weights
    stay far below the 32 MiB default scoped VMEM limit (and v7x's 64 MiB)."""
    MAX_BB = 1024
    n_steps = max(_cdiv(B, MAX_BB), min(4, _cdiv(B, 16)))
    n_steps = _round_up(max(n_steps, 2), 2)       # even -> both v7x TCs get work
    return min(MAX_BB, max(16, _round_up(_cdiv(B, n_steps), 16)))


def _linear_params(key, fan_in, fan_out):
    """Deterministic PyTorch-style init: U(-1/sqrt(fan_in), 1/sqrt(fan_in))."""
    kw, kb = jax.random.split(key)
    bound = 1.0 / math.sqrt(fan_in)
    # PyTorch stores weight as (out, in); we keep (in, out) for x @ W.
    w = jax.random.uniform(kw, (fan_in, fan_out), jnp.float32, -bound, bound)
    b = jax.random.uniform(kb, (1, fan_out), jnp.float32, -bound, bound)
    return w, b


def init_vae_params(key, input_dim=INPUT_DIM):
    keys = jax.random.split(key, 6)
    we1, be1 = _linear_params(keys[0], input_dim, 256)
    we2, be2 = _linear_params(keys[1], 256, 32)
    we3, be3 = _linear_params(keys[2], 32, 4)
    wd1, bd1 = _linear_params(keys[3], 2, 32)
    wd2, bd2 = _linear_params(keys[4], 32, 256)
    wd3, bd3 = _linear_params(keys[5], 256, input_dim)

    # Permute the last encoder layer's output columns so that
    # [:, 0:2] == torch h[:, 0::2] (mu) and [:, 2:4] == torch h[:, 1::2] (log_var).
    perm = jnp.array([0, 2, 1, 3], dtype=jnp.int32)
    we3 = we3[:, perm]
    be3 = be3[:, perm]

    # MXU-facing weights in bf16 (bf16 single-pass MXU path, half the DMA bytes).
    we1 = we1.astype(jnp.bfloat16)
    we2 = we2.astype(jnp.bfloat16)
    wd2 = wd2.astype(jnp.bfloat16)
    wd3 = wd3.astype(jnp.bfloat16)

    # Pack the six biases into a single lane-aligned (1, 1792) f32 buffer.
    bias_packed = jnp.zeros((1, _BIAS_TOTAL), jnp.float32)
    bias_packed = bias_packed.at[:, _BE1_OFF:_BE1_OFF + _BE1_N].set(be1)
    bias_packed = bias_packed.at[:, _BE2_OFF:_BE2_OFF + _BE2_N].set(be2)
    bias_packed = bias_packed.at[:, _BE3_OFF:_BE3_OFF + _BE3_N].set(be3)
    bias_packed = bias_packed.at[:, _BD1_OFF:_BD1_OFF + _BD1_N].set(bd1)
    bias_packed = bias_packed.at[:, _BD2_OFF:_BD2_OFF + _BD2_N].set(bd2)
    bias_packed = bias_packed.at[:, _BD3_OFF:_BD3_OFF + _BD3_N].set(bd3)

    return dict(we1=we1, be1=be1, we2=we2, be2=be2, we3=we3, be3=be3,
                wd1=wd1, bd1=bd1, wd2=wd2, bd2=bd2, wd3=wd3, bd3=bd3,
                bias_packed=bias_packed)


def vae_forward(x, eps, params, *, block_b=None, xrec_dtype=jnp.bfloat16):
    """Runs the whole VAE forward as one batch-tiled Pallas kernel.

    x: (B, input_dim), eps: (B, 2) (zeros reproduce the eval branch).
    Returns (x_rec [xrec_dtype], mu [f32], log_var [f32]).
    """
    B, D = x.shape
    p = params

    if block_b is None:
        block_b = _choose_block_b(B)
    block_b = min(1024, max(16, _round_up(int(block_b), 16)))

    # bf16 input halves the x HBM read bytes (the GEMM consumes bf16 anyway).
    x = x.astype(jnp.bfloat16)
    eps = eps.astype(jnp.float32)

    Bp = _round_up(B, block_b)
    if Bp != B:
        x = jnp.pad(x, ((0, Bp - B), (0, 0)))
        eps = jnp.pad(eps, ((0, Bp - B), (0, 0)))

    grid = (Bp // block_b,)

    def batch_map(i):
        return (i, 0)

    def const_map(i):
        return (0, 0)

    weight_args = (p["we1"], p["we2"], p["we3"],
                   p["wd1"], p["wd2"], p["wd3"],
                   p["bias_packed"])

    in_specs = (
        [pl.BlockSpec((block_b, D), batch_map),          # x tile
         pl.BlockSpec((block_b, 2), batch_map)]          # eps tile
        # Weights / packed bias: full-shape blocks, constant index_map ->
        # DMA'd once and kept resident in VMEM across all grid steps.
        + [pl.BlockSpec(w.shape, const_map) for w in weight_args]
    )
    out_specs = (
        pl.BlockSpec((block_b, D), batch_map),           # x_rec tile
        pl.BlockSpec((block_b, 4), batch_map),           # [mu | log_var] tile
    )
    out_shape = (
        jax.ShapeDtypeStruct((Bp, D), xrec_dtype),
        jax.ShapeDtypeStruct((Bp, 4), jnp.float32),
    )

    # Advisory cost hint so XLA can schedule/overlap the custom call.
    flops = 2 * Bp * (D * 256 + 256 * 32 + 32 * 4 + 2 * 32 + 32 * 256 + 256 * D)
    transcendentals = Bp * (D + 2)                       # tanh per output + exp per row
    bytes_accessed = (
        Bp * D * 2                                       # x read (bf16)
        + Bp * 2 * 4                                     # eps read
        + Bp * D * jnp.dtype(xrec_dtype).itemsize        # x_rec write
        + Bp * 4 * 4                                     # [mu | log_var] write
        + sum(int(w.size) * w.dtype.itemsize for w in weight_args)
    )
    cost = pl.CostEstimate(flops=int(flops),
                           transcendentals=int(transcendentals),
                           bytes_accessed=int(bytes_accessed))

    x_rec, mulv = pl.pallas_call(
        _vae_fwd_kernel,
        out_shape=out_shape,
        grid=grid,
        in_specs=in_specs,
        out_specs=out_specs,
        compiler_params=pltpu.CompilerParams(
            dimension_semantics=("parallel",),           # shard batch across TCs on v7x
        ),
        cost_estimate=cost,
    )(x, eps, *weight_args)

    x_rec = x_rec[:B]
    mulv = mulv[:B]
    return x_rec, mulv[:, 0:2], mulv[:, 2:4]


def vae_forward_reference(x, eps, params):
    """Pure-JAX reference with the same bf16-operand GEMMs for checking."""
    p = params
    xb = x.astype(jnp.bfloat16)
    h = jnp.maximum(
        jnp.dot(xb, p["we1"], preferred_element_type=jnp.float32) + p["be1"], 0.0)
    h = jnp.maximum(
        jnp.dot(h.astype(jnp.bfloat16), p["we2"],
                preferred_element_type=jnp.float32) + p["be2"], 0.0)
    h = jnp.dot(h, p["we3"], preferred_element_type=jnp.float32) + p["be3"]
    mu, log_var = h[:, 0:2], h[:, 2:4]
    z = mu + eps * jnp.exp(0.5 * log_var)
    d = jnp.maximum(z @ p["wd1"] + p["bd1"], 0.0)
    d = jnp.maximum(
        jnp.dot(d.astype(jnp.bfloat16), p["wd2"],
                preferred_element_type=jnp.float32) + p["bd2"], 0.0)
    d = jnp.dot(d.astype(jnp.bfloat16), p["wd3"],
                preferred_element_type=jnp.float32) + p["bd3"]
    x_rec = jax.nn.sigmoid(d)
    return x_rec, mu, log_var


if __name__ == "__main__":
    key = jax.random.PRNGKey(0)
    k_param, k_x, k_eps = jax.random.split(key, 3)

    B = 256
    params = init_vae_params(k_param, INPUT_DIM)

    x = jax.random.uniform(k_x, (B, INPUT_DIM), jnp.float32)     # "image" batch
    # training=True branch of forward(): eps ~ N(0, 1); zeros reproduce eval.
    eps = jax.random.normal(k_eps, (B, 2), jnp.float32)

    # default heuristic: B=256 -> block_b=64, grid=(4,) -> pipelined on 1 TC,
    # 2 pipelined steps per TC on v7x.
    x_rec, mu, log_var = vae_forward(x, eps, params)
    jax.block_until_ready((x_rec, mu, log_var))

    # sanity check against pure-JAX reference (bf16 GEMM operands + bf16
    # x_rec output -> loose tolerances)
    xr_ref, mu_ref, lv_ref = vae_forward_reference(x, eps, params)
    assert jnp.allclose(x_rec.astype(jnp.float32), xr_ref, atol=2e-2, rtol=2e-2)
    assert jnp.allclose(mu, mu_ref, atol=1e-2, rtol=1e-2)
    assert jnp.allclose(log_var, lv_ref, atol=1e-2, rtol=1e-2)

    print("KERNEL_OK")
</pallas_src>

<mosaic_0001>
module attributes {stable_mosaic.version = 11 : i64} {
  func.func @_vae_fwd_kernel(%arg0: i32, %arg1: memref<64x784xbf16, #tpu.memory_space<vmem>>, %arg2: memref<64x2xf32, #tpu.memory_space<vmem>>, %arg3: memref<784x256xbf16, #tpu.memory_space<vmem>>, %arg4: memref<256x32xbf16, #tpu.memory_space<vmem>>, %arg5: memref<32x4xf32, #tpu.memory_space<vmem>>, %arg6: memref<2x32xf32, #tpu.memory_space<vmem>>, %arg7: memref<32x256xbf16, #tpu.memory_space<vmem>>, %arg8: memref<256x784xbf16, #tpu.memory_space<vmem>>, %arg9: memref<1x1792xf32, #tpu.memory_space<vmem>>, %arg10: memref<64x784xbf16, #tpu.memory_space<vmem>>, %arg11: memref<64x4xf32, #tpu.memory_space<vmem>>) attributes {dimension_semantics = [#tpu.dimension_semantics<parallel>], iteration_bounds = array<i64: 4>, scalar_prefetch = 0 : i64, scratch_operands = 0 : i64, tpu.core_type = #tpu.core_type<tc>, window_params = [{transform_indices = @transform_0, window_bounds = array<i64: 64, 784>}, {transform_indices = @transform_1, window_bounds = array<i64: 64, 2>}, {pipeline_mode = #tpu.pipeline_mode<synchronous>, transform_indices = @transform_2, window_bounds = array<i64: 784, 256>}, {pipeline_mode = #tpu.pipeline_mode<synchronous>, transform_indices = @transform_3, window_bounds = array<i64: 256, 32>}, {pipeline_mode = #tpu.pipeline_mode<synchronous>, transform_indices = @transform_4, window_bounds = array<i64: 32, 4>}, {pipeline_mode = #tpu.pipeline_mode<synchronous>, transform_indices = @transform_5, window_bounds = array<i64: 2, 32>}, {pipeline_mode = #tpu.pipeline_mode<synchronous>, transform_indices = @transform_6, window_bounds = array<i64: 32, 256>}, {pipeline_mode = #tpu.pipeline_mode<synchronous>, transform_indices = @transform_7, window_bounds = array<i64: 256, 784>}, {pipeline_mode = #tpu.pipeline_mode<synchronous>, transform_indices = @transform_8, window_bounds = array<i64: 1, 1792>}, {transform_indices = @transform_9, window_bounds = array<i64: 64, 784>}, {transform_indices = @transform_10, window_bounds = array<i64: 64, 4>}]} {
    %c0 = arith.constant 0 : index
    %c0_0 = arith.constant 0 : index
    %0 = vector.load %arg9[%c0, %c0_0] : memref<1x1792xf32, #tpu.memory_space<vmem>>, vector<1x256xf32>
    %c0_1 = arith.constant 0 : index
    %c1408 = arith.constant 1408 : index
    %1 = vector.load %arg9[%c0_1, %c1408] : memref<1x1792xf32, #tpu.memory_space<vmem>>, vector<1x32xf32>
    %c0_2 = arith.constant 0 : index
    %c1536 = arith.constant 1536 : index
    %2 = vector.load %arg9[%c0_2, %c1536] : memref<1x1792xf32, #tpu.memory_space<vmem>>, vector<1x4xf32>
    %c0_3 = arith.constant 0 : index
    %c1664 = arith.constant 1664 : index
    %3 = vector.load %arg9[%c0_3, %c1664] : memref<1x1792xf32, #tpu.memory_space<vmem>>, vector<1x32xf32>
    %c0_4 = arith.constant 0 : index
    %c256 = arith.constant 256 : index
    %4 = vector.load %arg9[%c0_4, %c256] : memref<1x1792xf32, #tpu.memory_space<vmem>>, vector<1x256xf32>
    %c0_5 = arith.constant 0 : index
    %c512 = arith.constant 512 : index
    %5 = vector.load %arg9[%c0_5, %c512] : memref<1x1792xf32, #tpu.memory_space<vmem>>, vector<1x784xf32>
    %c0_6 = arith.constant 0 : index
    %c0_7 = arith.constant 0 : index
    %6 = vector.load %arg1[%c0_6, %c0_7] : memref<64x784xbf16, #tpu.memory_space<vmem>>, vector<64x784xbf16>
    %c0_8 = arith.constant 0 : index
    %c0_9 = arith.constant 0 : index
    %7 = vector.load %arg3[%c0_8, %c0_9] : memref<784x256xbf16, #tpu.memory_space<vmem>>, vector<784x256xbf16>
    %cst = arith.constant dense<0.000000e+00> : vector<64x256xf32>
    %8 = tpu.matmul %6, %7, %cst {dimension_numbers = #tpu.dot_dimension_numbers<[1], [0], [0], [1], [0, 0, 1, 1], [], []>} : vector<64x784xbf16>, vector<784x256xbf16>, vector<64x256xf32> -> vector<64x256xf32>
    %9 = vector.broadcast %0 : vector<1x256xf32> to vector<64x256xf32>
    %10 = arith.addf %8, %9 : vector<64x256xf32>
    %cst_10 = arith.constant 0.000000e+00 : f32
    %11 = vector.broadcast %cst_10 : f32 to vector<64x256xf32>
    %12 = arith.maximumf %10, %11 : vector<64x256xf32>
    %13 = arith.truncf %12 : vector<64x256xf32> to vector<64x256xbf16>
    %c0_11 = arith.constant 0 : index
    %c0_12 = arith.constant 0 : index
    %14 = vector.load %arg4[%c0_11, %c0_12] : memref<256x32xbf16, #tpu.memory_space<vmem>>, vector<256x32xbf16>
    %cst_13 = arith.constant dense<0.000000e+00> : vector<64x32xf32>
    %15 = tpu.matmul %13, %14, %cst_13 {dimension_numbers = #tpu.dot_dimension_numbers<[1], [0], [0], [1], [0, 0, 1, 1], [], []>} : vector<64x256xbf16>, vector<256x32xbf16>, vector<64x32xf32> -> vector<64x32xf32>
    %16 = vector.broadcast %1 : vector<1x32xf32> to vector<64x32xf32>
    %17 = arith.addf %15, %16 : vector<64x32xf32>
    %cst_14 = arith.constant 0.000000e+00 : f32
    %18 = vector.broadcast %cst_14 : f32 to vector<64x32xf32>
    %19 = arith.maximumf %17, %18 : vector<64x32xf32>
    %c0_15 = arith.constant 0 : index
    %c0_16 = arith.constant 0 : index
    %20 = vector.load %arg5[%c0_15, %c0_16] : memref<32x4xf32, #tpu.memory_space<vmem>>, vector<32x4xf32>
    %cst_17 = arith.constant dense<0.000000e+00> : vector<64x4xf32>
    %21 = tpu.matmul %19, %20, %cst_17 {dimension_numbers = #tpu.dot_dimension_numbers<[1], [0], [0], [1], [0, 0, 1, 1], [], []>} : vector<64x32xf32>, vector<32x4xf32>, vector<64x4xf32> -> vector<64x4xf32>
    %22 = vector.broadcast %2 : vector<1x4xf32> to vector<64x4xf32>
    %23 = arith.addf %21, %22 : vector<64x4xf32>
    %24 = vector.extract_strided_slice %23 {offsets = [0, 0], sizes = [64, 2], strides = [1, 1]} : vector<64x4xf32> to vector<64x2xf32>
    %25 = vector.extract_strided_slice %23 {offsets = [0, 2], sizes = [64, 2], strides = [1, 1]} : vector<64x4xf32> to vector<64x2xf32>
    %c0_18 = arith.constant 0 : index
    %c0_19 = arith.constant 0 : index
    %26 = vector.load %arg2[%c0_18, %c0_19] : memref<64x2xf32, #tpu.memory_space<vmem>>, vector<64x2xf32>
    %cst_20 = arith.constant 5.000000e-01 : f32
    %27 = vector.broadcast %cst_20 : f32 to vector<64x2xf32>
    %28 = arith.mulf %27, %25 : vector<64x2xf32>
    %29 = math.exp %28 : vector<64x2xf32>
    %30 = arith.mulf %26, %29 : vector<64x2xf32>
    %31 = arith.addf %24, %30 : vector<64x2xf32>
    %32 = vector.extract_strided_slice %31 {offsets = [0, 0], sizes = [64, 1], strides = [1, 1]} : vector<64x2xf32> to vector<64x1xf32>
    %c0_21 = arith.constant 0 : index
    %c0_22 = arith.constant 0 : index
    %33 = vector.load %arg6[%c0_21, %c0_22] : memref<2x32xf32, #tpu.memory_space<vmem>>, vector<1x32xf32>
    %34 = vector.broadcast %32 : vector<64x1xf32> to vector<64x32xf32>
    %35 = vector.broadcast %33 : vector<1x32xf32> to vector<64x32xf32>
    %36 = arith.mulf %34, %35 : vector<64x32xf32>
    %37 = vector.extract_strided_slice %31 {offsets = [0, 1], sizes = [64, 1], strides = [1, 1]} : vector<64x2xf32> to vector<64x1xf32>
    %c1 = arith.constant 1 : index
    %c0_23 = arith.constant 0 : index
    %38 = vector.load %arg6[%c1, %c0_23] : memref<2x32xf32, #tpu.memory_space<vmem>>, vector<1x32xf32>
    %39 = vector.broadcast %37 : vector<64x1xf32> to vector<64x32xf32>
    %40 = vector.broadcast %38 : vector<1x32xf32> to vector<64x32xf32>
    %41 = arith.mulf %39, %40 : vector<64x32xf32>
    %42 = arith.addf %36, %41 : vector<64x32xf32>
    %43 = vector.broadcast %3 : vector<1x32xf32> to vector<64x32xf32>
    %44 = arith.addf %42, %43 : vector<64x32xf32>
    %cst_24 = arith.constant 0.000000e+00 : f32
    %45 = vector.broadcast %cst_24 : f32 to vector<64x32xf32>
    %46 = arith.maximumf %44, %45 : vector<64x32xf32>
    %47 = arith.truncf %46 : vector<64x32xf32> to vector<64x32xbf16>
    %c0_25 = arith.constant 0 : index
    %c0_26 = arith.constant 0 : index
    %48 = vector.load %arg7[%c0_25, %c0_26] : memref<32x256xbf16, #tpu.memory_space<vmem>>, vector<32x256xbf16>
    %cst_27 = arith.constant dense<0.000000e+00> : vector<64x256xf32>
    %49 = tpu.matmul %47, %48, %cst_27 {dimension_numbers = #tpu.dot_dimension_numbers<[1], [0], [0], [1], [0, 0, 1, 1], [], []>} : vector<64x32xbf16>, vector<32x256xbf16>, vector<64x256xf32> -> vector<64x256xf32>
    %50 = vector.broadcast %4 : vector<1x256xf32> to vector<64x256xf32>
    %51 = arith.addf %49, %50 : vector<64x256xf32>
    %cst_28 = arith.constant 0.000000e+00 : f32
    %52 = vector.broadcast %cst_28 : f32 to vector<64x256xf32>
    %53 = arith.maximumf %51, %52 : vector<64x256xf32>
    %54 = arith.truncf %53 : vector<64x256xf32> to vector<64x256xbf16>
    %c0_29 = arith.constant 0 : index
    %c0_30 = arith.constant 0 : index
    %55 = vector.load %arg8[%c0_29, %c0_30] : memref<256x784xbf16, #tpu.memory_space<vmem>>, vector<256x784xbf16>
    %cst_31 = arith.constant dense<0.000000e+00> : vector<64x784xf32>
    %56 = tpu.matmul %54, %55, %cst_31 {dimension_numbers = #tpu.dot_dimension_numbers<[1], [0], [0], [1], [0, 0, 1, 1], [], []>} : vector<64x256xbf16>, vector<256x784xbf16>, vector<64x784xf32> -> vector<64x784xf32>
    %57 = vector.broadcast %5 : vector<1x784xf32> to vector<64x784xf32>
    %58 = arith.addf %56, %57 : vector<64x784xf32>
    %cst_32 = arith.constant 5.000000e-01 : f32
    %59 = vector.broadcast %cst_32 : f32 to vector<64x784xf32>
    %60 = arith.mulf %59, %58 : vector<64x784xf32>
    %61 = math.tanh %60 : vector<64x784xf32>
    %cst_33 = arith.constant 5.000000e-01 : f32
    %62 = vector.broadcast %cst_33 : f32 to vector<64x784xf32>
    %63 = arith.mulf %62, %61 : vector<64x784xf32>
    %cst_34 = arith.constant 5.000000e-01 : f32
    %64 = vector.broadcast %cst_34 : f32 to vector<64x784xf32>
    %65 = arith.addf %63, %64 : vector<64x784xf32>
    %66 = arith.truncf %65 : vector<64x784xf32> to vector<64x784xbf16>
    %c0_35 = arith.constant 0 : index
    %c0_36 = arith.constant 0 : index
    %67 = vector.load %arg10[%c0_35, %c0_36] : memref<64x784xbf16, #tpu.memory_space<vmem>>, vector<64x784xbf16>
    tpu.vector_store %arg10[%c0_35, %c0_36], %66 {strides = array<i32>} : memref<64x784xbf16, #tpu.memory_space<vmem>>, vector<64x784xbf16>,
    %c0_37 = arith.constant 0 : index
    %c0_38 = arith.constant 0 : index
    %68 = vector.load %arg11[%c0_37, %c0_38] : memref<64x4xf32, #tpu.memory_space<vmem>>, vector<64x4xf32>
    tpu.vector_store %arg11[%c0_37, %c0_38], %23 {strides = array<i32>} : memref<64x4xf32, #tpu.memory_space<vmem>>, vector<64x4xf32>,
    return
  }
  func.func @transform_0(%arg0: i32) -> (i32, i32) {
    %c0_i32 = arith.constant 0 : i32
    %c0_i32_0 = arith.constant 0 : i32
    return %arg0, %c0_i32 : i32, i32
  }
  func.func @transform_1(%arg0: i32) -> (i32, i32) {
    %c0_i32 = arith.constant 0 : i32
    %c0_i32_0 = arith.constant 0 : i32
    return %arg0, %c0_i32 : i32, i32
  }
  func.func @transform_2(%arg0: i32) -> (i32, i32) {
    %c0_i32 = arith.constant 0 : i32
    %c0_i32_0 = arith.constant 0 : i32
    %c0_i32_1 = arith.constant 0 : i32
    return %c0_i32, %c0_i32_0 : i32, i32
  }
  func.func @transform_3(%arg0: i32) -> (i32, i32) {
    %c0_i32 = arith.constant 0 : i32
    %c0_i32_0 = arith.constant 0 : i32
    %c0_i32_1 = arith.constant 0 : i32
    return %c0_i32, %c0_i32_0 : i32, i32
  }
  func.func @transform_4(%arg0: i32) -> (i32, i32) {
    %c0_i32 = arith.constant 0 : i32
    %c0_i32_0 = arith.constant 0 : i32
    %c0_i32_1 = arith.constant 0 : i32
    return %c0_i32, %c0_i32_0 : i32, i32
  }
  func.func @transform_5(%arg0: i32) -> (i32, i32) {
    %c0_i32 = arith.constant 0 : i32
    %c0_i32_0 = arith.constant 0 : i32
    %c0_i32_1 = arith.constant 0 : i32
    return %c0_i32, %c0_i32_0 : i32, i32
  }
  func.func @transform_6(%arg0: i32) -> (i32, i32) {
    %c0_i32 = arith.constant 0 : i32
    %c0_i32_0 = arith.constant 0 : i32
    %c0_i32_1 = arith.constant 0 : i32
    return %c0_i32, %c0_i32_0 : i32, i32
  }
  func.func @transform_7(%arg0: i32) -> (i32, i32) {
    %c0_i32 = arith.constant 0 : i32
    %c0_i32_0 = arith.constant 0 : i32
    %c0_i32_1 = arith.constant 0 : i32
    return %c0_i32, %c0_i32_0 : i32, i32
  }
  func.func @transform_8(%arg0: i32) -> (i32, i32) {
    %c0_i32 = arith.constant 0 : i32
    %c0_i32_0 = arith.constant 0 : i32
    %c0_i32_1 = arith.constant 0 : i32
    return %c0_i32, %c0_i32_0 : i32, i32
  }
  func.func @transform_9(%arg0: i32) -> (i32, i32) {
    %c0_i32 = arith.constant 0 : i32
    %c0_i32_0 = arith.constant 0 : i32
    return %arg0, %c0_i32 : i32, i32
  }
  func.func @transform_10(%arg0: i32) -> (i32, i32) {
    %c0_i32 = arith.constant 0 : i32
    %c0_i32_0 = arith.constant 0 : i32
    return %arg0, %c0_i32 : i32, i32
  }
}

</mosaic_0001>

<bundles_post_ra>
// kernel: tpu_custom_call.1
= control target key start
LH: loop header
LB: loop body
LE: loop exit
PB: predicated region body
PF: predicated region fallthrough
CT: control target
= control target key end

     0   :  { %s4913_s13 = smov 0   ;;  %s6044_s0 = inlined_call_operand.vmem [shape: bf16[256,784], index: 0, kind: input, shape index: {}]   ;;  %s6045_s1 = inlined_call_operand.vmem [shape: f32[256,2], index: 1, kind: input, shape index: {}]   ;;  %s6046_s2 = inlined_call_operand.vmem [shape: bf16[784,256], index: 2, kind: input, shape index: {}]   ;;  %s6047_s3 = inlined_call_operand.vmem [shape: bf16[256,32], index: 3, kind: input, shape index: {}]   ;;  %s6048_s4 = inlined_call_operand.vmem [shape: f32[32,4], index: 4, kind: input, shape index: {}]   ;;  %s6049_s5 = inlined_call_operand.vmem [shape: f32[2,32], index: 5, kind: input, shape index: {}]   ;;  %s6050_s6 = inlined_call_operand.vmem [shape: bf16[32,256], index: 6, kind: input, shape index: {}]   ;;  %s6051_s7 = inlined_call_operand.vmem [shape: bf16[256,784], index: 7, kind: input, shape index: {}]   ;;  %s6052_s8 = inlined_call_operand.vmem [shape: f32[1,1792], index: 8, kind: input, shape index: {}]   ;;  %s6053_s9 = inlined_call_operand.vmem [shape: bf16[256,784], index: 9, kind: output, shape index: {0}]   ;;  %s6054_s10 = inlined_call_operand.vmem [shape: f32[256,4], index: 10, kind: output, shape index: {1}]  }
   0x1 LB: > { %s3784_s14 = sadd.s32 4294967295, %s4853_s13   ;;  %p3788_p0 = scmp.ge.s32.totalorder %s4853_s13, 1  ;;  %s4853_s13 = sphi %s4913_s13, %s21_s13  }
   0x2   : > { %p328_p1 = scmp.lt.s32.totalorder %s4853_s13, 5 }
   0x4   : > { %p329_p2 = pnand %p3788_p0, %p328_p1 }
   0x5   : > { %v4350_v0 = vld [vmem:[%s6046_s2 + $0x4] ss:$8 sps:$4 sm:$0xff] (!%p329_p2)   ;;  %v4352_v1 = vld [vmem:[%s6046_s2] ss:$8 sps:$4 sm:$0xff] (!%p329_p2)   ;;  %v4353_v2 = vld [vmem:[%s6046_s2 + $0x14] ss:$8 sps:$4 sm:$0xff] (!%p329_p2)  }
   0x6   : > { %332 = sbr.rel (%p329_p2) target bundleno = 1780 (0x6f4), region = 56  ;;  %1195 = vmatprep.subr.bf16.mxu0 (!%p329_p2), %v4350_v0  ;;  %v4355_v3 = vld [vmem:[%s6046_s2 + $0x10] ss:$8 sps:$4 sm:$0xff] (!%p329_p2)   ;;  %v4356_v4 = vld [vmem:[%s6046_s2 + $0x24] ss:$8 sps:$4 sm:$0xff] (!%p329_p2)   ;;  %s3789_s25 = sshll.u32 (!%p329_p2), %s3784_s14, 3 }
   0x7   : > { %1196 = vmatpush1.bf16.msra.mxu0 (!%p329_p2), %v4352_v1  ;;  %v4358_v5 = vld [vmem:[%s6046_s2 + $0x20] ss:$8 sps:$4 sm:$0xff] (!%p329_p2)   ;;  %p379_p3 = scmp.lt.s32.totalorder (!%p329_p2), %s3789_s25, 31  ;;  %v4359_v6 = vld [vmem:[%s6046_s2 + $0x34] ss:$8 sps:$4 sm:$0xff] (!%p329_p2)   ;;  %v4855_v58 = vmov (!%p329_p2), 0  }
   0x8   : > { %1197 = vmatprep.subr.bf16.mxu0 (!%p329_p2), %v4353_v2  ;;  %v4361_v7 = vld [vmem:[%s6046_s2 + $0x30] ss:$8 sps:$4 sm:$0xff] (!%p329_p2)   ;;  %v4362_v8 = vld [vmem:[%s6046_s2 + $0x44] ss:$8 sps:$4 sm:$0xff] (!%p329_p2)   ;;  %v4364_v9 = vld [vmem:[%s6046_s2 + $0x40] ss:$8 sps:$4 sm:$0xff] (!%p329_p2)   ;;  %4339 = vset.pattern.permute.xlu0 (!%p329_p2), %v4855_v58 }
   0x9   : > { %v4365_v10 = vld [vmem:[%s6046_s2 + $0x54] ss:$8 sps:$4 sm:$0xff] (!%p329_p2)   ;;  %v4367_v11 = vld [vmem:[%s6046_s2 + $0x50] ss:$8 sps:$4 sm:$0xff] (!%p329_p2)   ;;  %v4368_v12 = vld [vmem:[%s6046_s2 + $0x64] ss:$8 sps:$4 sm:$0xff] (!%p329_p2)   ;;  %4338 = vset.pattern.permute.xlu1 (!%p329_p2), %v4855_v58 }
   0xa   : > { %v4370_v14 = vld [vmem:[%s6046_s2 + $0x60] ss:$8 sps:$4 sm:$0xff] (!%p329_p2)   ;;  %v4371_v15 = vld [vmem:[%s6046_s2 + $0x74] ss:$8 sps:$4 sm:$0xff] (!%p329_p2)   ;;  %v4373_v16 = vld [vmem:[%s6046_s2 + $0x70] ss:$8 sps:$4 sm:$0xff] (!%p329_p2)  }
   0xb   : > { %1198 = vmatpush1.bf16.msra.mxu0 (!%p329_p2), %v4355_v3  ;;  %v4374_v17 = vld [vmem:[%s6046_s2 + $0x84] ss:$8 sps:$4 sm:$0xff] (!%p329_p2)   ;;  %v4376_v18 = vld [vmem:[%s6046_s2 + $0x80] ss:$8 sps:$4 sm:$0xff] (!%p329_p2)   ;;  %v4377_v19 = vld [vmem:[%s6046_s2 + $0x94] ss:$8 sps:$4 sm:$0xff] (!%p329_p2)  }
   0xc   : > { %1199 = vmatprep.subr.bf16.mxu0 (!%p329_p2), %v4356_v4  ;;  %v4379_v20 = vld [vmem:[%s6046_s2 + $0x90] ss:$8 sps:$4 sm:$0xff] (!%p329_p2)   ;;  %v4380_v21 = vld [vmem:[%s6046_s2 + $0xa4] ss:$8 sps:$4 sm:$0xff] (!%p329_p2)   ;;  %v4382_v22 = vld [vmem:[%s6046_s2 + $0xa0] ss:$8 sps:$4 sm:$0xff] (!%p329_p2)  }
   0xd   : > { %s6056_s25 = smov (!%p379_p3, %s3789_s25), 31  ;;  %v4383_v23 = vld [vmem:[%s6046_s2 + $0xb4] ss:$8 sps:$4 sm:$0xff]   ;;  %v4385_v24 = vld [vmem:[%s6046_s2 + $0xb0] ss:$8 sps:$4 sm:$0xff]   ;;  %vm1182_vm0 = vcmask 130048  }
   0xe   : > { %s4326_s17 = smul.u32 28, %s6056_s25  ;;  %v4386_v25 = vld [vmem:[%s6046_s2 + $0xc4] ss:$8 sps:$4 sm:$0xff]   ;;  %v4388_v26 = vld [vmem:[%s6046_s2 + $0xc0] ss:$8 sps:$4 sm:$0xff]   ;;  %vm1728_vm1 = vcmask 261120  }
   0xf   : > { %1200 = vmatpush1.bf16.msra.mxu0 %v4358_v5  ;;  %v4389_v27 = vld [vmem:[%s6046_s2 + $0xd4] ss:$8 sps:$4 sm:$0xff]   ;;  %v4391_v28 = vld [vmem:[%s6046_s2 + $0xd0] ss:$8 sps:$4 sm:$0xff]   ;;  %v4392_v29 = vld [vmem:[%s6046_s2 + $0xe4] ss:$8 sps:$4 sm:$0xff]  }
  0x10   : > { %1201 = vmatprep.subr.bf16.mxu0 %v4359_v6  ;;  %s4965_s24 = scalar_lea.vmem %s6044_s0, %s4326_s17  ;;  %v4394_v30 = vld [vmem:[%s6046_s2 + $0xe0] ss:$8 sps:$4 sm:$0xff]   ;;  %v4395_v31 = vld [vmem:[%s6046_s2 + $0xf4] ss:$8 sps:$4 sm:$0xff]   ;;  %v4397_v32 = vld [vmem:[%s6046_s2 + $0xf0] ss:$8 sps:$4 sm:$0xff]   ;;  %s5936_s12 = scalar_lea.vmem %s6053_s9, %s4326_s17 }
  0x11   : > { %v4400_v13 = vld [vmem:[%s4965_s24 + $0x4] ss:$28 sps:$4 sm:$0xff]   ;;  %v4431_v36 = vld [vmem:[%s4965_s24 + $0x3c] ss:$28 sps:$4 sm:$0xff]   ;;  %v4440_v42 = vld [vmem:[%s4965_s24 + $0x74] ss:$28 sps:$4 sm:$0xff]  }
  0x12   : > { %1227 = vmatprep.mubr.bf16.mxu0 %v4400_v13  ;;  %v4403_v33 = vld [vmem:[%s6046_s2 + $0x104] ss:$8 sps:$4 sm:$0xff]   ;;  %v4398_v34 = vld [vmem:[%s4965_s24] ss:$28 sps:$4 sm:$0xff]   ;;  %v4404_v38 = vld [vmem:[%s6046_s2 + $0x110] ss:$8 sps:$4 sm:$0xff]  }
  0x13   : > { %1202 = vmatpush1.bf16.msra.mxu0 %v4361_v7  ;;  %v4401_v35 = vld [vmem:[%s6046_s2 + $0x100] ss:$8 sps:$4 sm:$0xff]   ;;  %v4406_v37 = vld [vmem:[%s6046_s2 + $0x114] ss:$8 sps:$4 sm:$0xff]   ;;  %v4409_v39 = vld [vmem:[%s6046_s2 + $0x124] ss:$8 sps:$4 sm:$0xff]  }
  0x14   : > { %1203 = vmatprep.subr.bf16.mxu0 %v4362_v8  ;;  %v4436_v40 = vld [vmem:[%s4965_s24 + $0x38] ss:$28 sps:$4 sm:$0xff]   ;;  %v4407_v41 = vld [vmem:[%s6046_s2 + $0x120] ss:$8 sps:$4 sm:$0xff]   ;;  %v4415_v45 = vld [vmem:[%s6046_s2 + $0x144] ss:$8 sps:$4 sm:$0xff]  }
  0x15   : > { %v4412_v43 = vld [vmem:[%s6046_s2 + $0x134] ss:$8 sps:$4 sm:$0xff]   ;;  %v4410_v44 = vld [vmem:[%s6046_s2 + $0x130] ss:$8 sps:$4 sm:$0xff]   ;;  %v4413_v46 = vld [vmem:[%s6046_s2 + $0x140] ss:$8 sps:$4 sm:$0xff]  }
  0x16   : > { %v4445_v47 = vld [vmem:[%s4965_s24 + $0x70] ss:$28 sps:$4 sm:$0xff]   ;;  %v4418_v48 = vld [vmem:[%s6046_s2 + $0x154] ss:$8 sps:$4 sm:$0xff]   ;;  %v4454_v52 = vld [vmem:[%s4965_s24 + $0xa8] ss:$28 sps:$4 sm:$0xff]  }
  0x17   : > { %1204 = vmatpush1.bf16.msra.mxu0 %v4364_v9  ;;  %v4449_v49 = vld [vmem:[%s4965_s24 + $0xac] ss:$28 sps:$4 sm:$0xff]   ;;  %v4416_v50 = vld [vmem:[%s6046_s2 + $0x150] ss:$8 sps:$4 sm:$0xff]   ;;  %v4424_v55 = vld [vmem:[%s6046_s2 + $0x174] ss:$8 sps:$4 sm:$0xff]  }
  0x18   : > { %1205 = vmatprep.subr.bf16.mxu0 %v4365_v10  ;;  %v4421_v51 = vld [vmem:[%s6046_s2 + $0x164] ss:$8 sps:$4 sm:$0xff]   ;;  %v4419_v53 = vld [vmem:[%s6046_s2 + $0x160] ss:$8 sps:$4 sm:$0xff]   ;;  %v4422_v56 = vld [vmem:[%s6046_s2 + $0x170] ss:$8 sps:$4 sm:$0xff]  }
  0x19   : > { %v4460_v54 = vld [vmem:[%s4965_s24 + $0xc] ss:$28 sps:$4 sm:$0xff]   ;;  %v4430_v60 = vld [vmem:[%s6046_s2 + $0x194] ss:$8 sps:$4 sm:$0xff]   ;;  %v4428_v61 = vld [vmem:[%s6046_s2 + $0x190] ss:$8 sps:$4 sm:$0xff]  }
  0x1a   : > { %v4427_v57 = vld [vmem:[%s6046_s2 + $0x184] ss:$8 sps:$4 sm:$0xff]   ;;  %v4425_v59 = vld [vmem:[%s6046_s2 + $0x180] ss:$8 sps:$4 sm:$0xff]   ;;  %v4439_v0 = vld [vmem:[%s6046_s2 + $0x1b4] ss:$8 sps:$4 sm:$0xff]  }
  0x1b   : > { %1206 = vmatpush1.bf16.msra.mxu0 %v4367_v11  ;;  %v4435_v62 = vld [vmem:[%s6046_s2 + $0x1a4] ss:$8 sps:$4 sm:$0xff]   ;;  %v4433_v63 = vld [vmem:[%s6046_s2 + $0x1a0] ss:$8 sps:$4 sm:$0xff]   ;;  %v4437_v1 = vld [vmem:[%s6046_s2 + $0x1b0] ss:$8 sps:$4 sm:$0xff]  }
  0x1c   : > { %1207 = vmatprep.subr.bf16.mxu0 %v4368_v12  ;;  %v4444_v2 = vld [vmem:[%s6046_s2 + $0x1c4] ss:$8 sps:$4 sm:$0xff]   ;;  %v4442_v3 = vld [vmem:[%s6046_s2 + $0x1c0] ss:$8 sps:$4 sm:$0xff]   ;;  %v4448_v4 = vld [vmem:[%s6046_s2 + $0x1d4] ss:$8 sps:$4 sm:$0xff]  }
  0x1d   : > { %v4446_v5 = vld [vmem:[%s6046_s2 + $0x1d0] ss:$8 sps:$4 sm:$0xff]   ;;  %v4453_v6 = vld [vmem:[%s6046_s2 + $0x1e4] ss:$8 sps:$4 sm:$0xff]   ;;  %v4451_v7 = vld [vmem:[%s6046_s2 + $0x1e0] ss:$8 sps:$4 sm:$0xff]  }
  0x1e   : > { %v4457_v8 = vld [vmem:[%s6046_s2 + $0x1f4] ss:$8 sps:$4 sm:$0xff]   ;;  %v4537_v9 = vld [vmem:[%s6047_s3 + $0x40] sm:$0xff]   ;;  %v4539_v11 = vld [vmem:[%s6047_s3 + $0x48] sm:$0xff]   ;;  %s3792_s14 = sshll.u32 %s6056_s25, 3  ;;  %vm3671_vm2 = vcmask 31744  }
  0x1f   : > { %1208 = vmatpush1.bf16.msra.mxu0 %v4370_v14  ;;  %v4538_v10 = vld [vmem:[%s6047_s3] sm:$0xff]   ;;  %v4455_v12 = vld [vmem:[%s6046_s2 + $0x1f0] ss:$8 sps:$4 sm:$0xff]   ;;  %4142 = vmatprep.subr.bf16.mxu1 %v4537_v9  ;;  %s5353_s19 = scalar_lea.vmem %s6054_s10, %s3792_s14  ;;  %s4856_s20 = smov 126   ;;  %vm3641_vm3 = vcmask 125952  }
  0x20   : > { %1209 = vmatprep.subr.bf16.mxu0 %v4371_v15  ;;  %v4458_v13 = vld [vmem:[%s4965_s24 + $0x8] ss:$28 sps:$4 sm:$0xff]   ;;  %4143 = vmatpush3.bf16.msra.mxu1 %v4538_v10  ;;  %v4536_v10 = vld [vmem:[%s4965_s24 + $0xc0] ss:$28 sps:$4 sm:$0xff]   ;;  %s5416_s23 = scalar_lea.vmem %s6045_s1, %s3792_s14 }
  0x21   : > { %v4463_v14 = vld [vmem:[%s6046_s2 + $0x204] ss:$8 sps:$4 sm:$0xff]   ;;  %v4461_v15 = vld [vmem:[%s6046_s2 + $0x200] ss:$8 sps:$4 sm:$0xff]   ;;  %4144 = vmatprep.subr.bf16.mxu1 %v4539_v11 }
  0x22   : > { %v4535_v9 = vld [vmem:[%s4965_s24 + $0x88] ss:$28 sps:$4 sm:$0xff]  }
  0x23   : > { %1210 = vmatpush1.bf16.msra.mxu0 %v4373_v16  ;;  %v4491_v16 = vld [vmem:[%s4965_s24 + $0x44] ss:$28 sps:$4 sm:$0xff]   ;;  %v4548_v11 = vld [vmem:[%s6047_s3 + $0x28] sm:$0xff]  }
  0x24   : > { %1211 = vmatprep.subr.bf16.mxu0 %v4374_v17  ;;  %v4540_v17 = vld [vmem:[%s6047_s3 + $0x8] sm:$0xff]  }
  0x25   : > { %4145 = vmatpush3.bf16.msra.mxu1 %v4540_v17  ;;  %v1719_v17 = vld [vmem:[%s6048_s4 + $0x8] sm:$0xff] }
  0x27   : > { %1212 = vmatpush1.bf16.msra.mxu0 %v4376_v18  ;;  %v4541_v18 = vld [vmem:[%s6047_s3 + $0x50] sm:$0xff]  }
  0x28   : > { %1213 = vmatprep.subr.bf16.mxu0 %v4377_v19  ;;  %v4466_v19 = vld [vmem:[%s6046_s2 + $0x214] ss:$8 sps:$4 sm:$0xff]   ;;  %4146 = vmatprep.subr.bf16.mxu1 %v4541_v18 }
  0x2b   : > { %1214 = vmatpush1.bf16.msra.mxu0 %v4379_v20  ;;  %v4542_v20 = vld [vmem:[%s6047_s3 + $0x10] sm:$0xff]  }
  0x2c   : > { %1215 = vmatprep.subr.bf16.mxu0 %v4380_v21  ;;  %v4543_v21 = vld [vmem:[%s6047_s3 + $0x58] sm:$0xff]   ;;  %4147 = vmatpush3.bf16.msra.mxu1 %v4542_v20 }
  0x2d   : > { %4148 = vmatprep.subr.bf16.mxu1 %v4543_v21 }
  0x2f   : > { %1216 = vmatpush1.bf16.msra.mxu0 %v4382_v22  ;;  %v4464_v22 = vld [vmem:[%s6046_s2 + $0x210] ss:$8 sps:$4 sm:$0xff]  }
  0x30   : > { %1217 = vmatprep.subr.bf16.mxu0 %v4383_v23  ;;  %v4469_v23 = vld [vmem:[%s6046_s2 + $0x224] ss:$8 sps:$4 sm:$0xff]  }
  0x33   : > { %1218 = vmatpush1.bf16.msra.mxu0 %v4385_v24  ;;  %v4544_v24 = vld [vmem:[%s6047_s3 + $0x18] sm:$0xff]  }
  0x34   : > { %1219 = vmatprep.subr.bf16.mxu0 %v4386_v25  ;;  %v4493_v25 = vld [vmem:[%s4965_s24 + $0x40] ss:$28 sps:$4 sm:$0xff]   ;;  %4149 = vmatpush3.bf16.msra.mxu1 %v4544_v24 }
  0x37   : > { %1220 = vmatpush1.bf16.msra.mxu0 %v4388_v26  ;;  %v4545_v26 = vld [vmem:[%s6047_s3 + $0x60] sm:$0xff]  }
  0x38   : > { %1221 = vmatprep.subr.bf16.mxu0 %v4389_v27  ;;  %v4467_v27 = vld [vmem:[%s6046_s2 + $0x220] ss:$8 sps:$4 sm:$0xff]   ;;  %4150 = vmatprep.subr.bf16.mxu1 %v4545_v26 }
  0x3b   : > { %1222 = vmatpush1.bf16.msra.mxu0 %v4391_v28  ;;  %v4500_v28 = vld [vmem:[%s4965_s24 + $0x7c] ss:$28 sps:$4 sm:$0xff]  }
  0x3c   : > { %1223 = vmatprep.subr.bf16.mxu0 %v4392_v29  ;;  %v4472_v29 = vld [vmem:[%s6046_s2 + $0x234] ss:$8 sps:$4 sm:$0xff]  }
  0x3f   : > { %1224 = vmatpush1.bf16.msra.mxu0 %v4394_v30  ;;  %v4546_v30 = vld [vmem:[%s6047_s3 + $0x20] sm:$0xff]  }
  0x40   : > { %1225 = vmatprep.subr.bf16.mxu0 %v4395_v31  ;;  %v4547_v31 = vld [vmem:[%s6047_s3 + $0x68] sm:$0xff]   ;;  %4151 = vmatpush3.bf16.msra.mxu1 %v4546_v30 }
  0x41   : > { %4152 = vmatprep.subr.bf16.mxu1 %v4547_v31 }
  0x43   : > { %1226 = vmatpush1.bf16.msra.mxu0 %v4397_v32  ;;  %v4470_v32 = vld [vmem:[%s6046_s2 + $0x230] ss:$8 sps:$4 sm:$0xff]  }
  0x44   : > { %1268 = vmatprep.subr.bf16.mxu0 %v4403_v33  ;;  %v4475_v33 = vld [vmem:[%s6046_s2 + $0x244] ss:$8 sps:$4 sm:$0xff]   ;;  %4153 = vmatpush3.bf16.msra.mxu1 %v4548_v11 }
  0x46   : > { %1228 = vmatmul.mubr.bf16.vlgmr.msra.gmra.mrb[0].mxu0 %v4398_v34  ;;  %v4502_v34 = vld [vmem:[%s4965_s24 + $0x78] ss:$28 sps:$4 sm:$0xff]  }
  0x47   : > { %1269 = vmatpush1.bf16.msra.mxu0 %v4401_v35  ;;  %1237 = vmatprep.mubr.bf16.mxu0 %v4431_v36  ;;  %v4473_v35 = vld [vmem:[%s6046_s2 + $0x240] ss:$8 sps:$4 sm:$0xff]   ;;  %v4509_v36 = vld [vmem:[%s4965_s24 + $0xb4] ss:$28 sps:$4 sm:$0xff]  }
  0x48   : > { %1270 = vmatprep.subr.bf16.mxu0 %v4406_v37  ;;  %v4478_v37 = vld [vmem:[%s6046_s2 + $0x254] ss:$8 sps:$4 sm:$0xff]  }
  0x4b   : > { %1271 = vmatpush1.bf16.msra.mxu0 %v4404_v38  ;;  %v4476_v38 = vld [vmem:[%s6046_s2 + $0x250] ss:$8 sps:$4 sm:$0xff]  }
  0x4c   : > { %1272 = vmatprep.subr.bf16.mxu0 %v4409_v39  ;;  %v4481_v39 = vld [vmem:[%s6046_s2 + $0x264] ss:$8 sps:$4 sm:$0xff]  }
  0x4e   : > { %1238 = vmatmul.mubr.bf16.gmra.mrb[4].mxu0 %v4436_v40  ;;  %v4511_v40 = vld [vmem:[%s4965_s24 + $0xb0] ss:$28 sps:$4 sm:$0xff]  }
  0x4f   : > { %1273 = vmatpush1.bf16.msra.mxu0 %v4407_v41  ;;  %1247 = vmatprep.mubr.bf16.mxu0 %v4440_v42  ;;  %v4479_v41 = vld [vmem:[%s6046_s2 + $0x260] ss:$8 sps:$4 sm:$0xff]   ;;  %v4520_v42 = vld [vmem:[%s4965_s24 + $0x14] ss:$28 sps:$4 sm:$0xff]  }
  0x50   : > { %1274 = vmatprep.subr.bf16.mxu0 %v4412_v43  ;;  %v4484_v43 = vld [vmem:[%s6046_s2 + $0x274] ss:$8 sps:$4 sm:$0xff]  }
  0x53   : > { %1275 = vmatpush1.bf16.msra.mxu0 %v4410_v44  ;;  %v4482_v44 = vld [vmem:[%s6046_s2 + $0x270] ss:$8 sps:$4 sm:$0xff]  }
  0x54   : > { %1276 = vmatprep.subr.bf16.mxu0 %v4415_v45  ;;  %v4487_v45 = vld [vmem:[%s6046_s2 + $0x284] ss:$8 sps:$4 sm:$0xff]  }
  0x56   : > { %1248 = vmatmul.mubr.bf16.gmra.mrb[8].mxu0 %v4445_v47  ;;  %v4490_v47 = vld [vmem:[%s6046_s2 + $0x294] ss:$8 sps:$4 sm:$0xff]  }
  0x57   : > { %1277 = vmatpush1.bf16.msra.mxu0 %v4413_v46  ;;  %1257 = vmatprep.mubr.bf16.mxu0 %v4449_v49  ;;  %v4485_v46 = vld [vmem:[%s6046_s2 + $0x280] ss:$8 sps:$4 sm:$0xff]   ;;  %v4496_v49 = vld [vmem:[%s6046_s2 + $0x2a4] ss:$8 sps:$4 sm:$0xff]  }
  0x58   : > { %1278 = vmatprep.subr.bf16.mxu0 %v4418_v48  ;;  %v4488_v48 = vld [vmem:[%s6046_s2 + $0x290] ss:$8 sps:$4 sm:$0xff]  }
  0x5b   : > { %1279 = vmatpush1.bf16.msra.mxu0 %v4416_v50  ;;  %v4494_v50 = vld [vmem:[%s6046_s2 + $0x2a0] ss:$8 sps:$4 sm:$0xff]  }
  0x5c   : > { %1280 = vmatprep.subr.bf16.mxu0 %v4421_v51  ;;  %v4499_v51 = vld [vmem:[%s6046_s2 + $0x2b4] ss:$8 sps:$4 sm:$0xff]  }
  0x5e   : > { %1258 = vmatmul.mubr.bf16.gmra.mrb[12].mxu0 %v4454_v52  ;;  %v4497_v52 = vld [vmem:[%s6046_s2 + $0x2b0] ss:$8 sps:$4 sm:$0xff]  }
  0x5f   : > { %1281 = vmatpush1.bf16.msra.mxu0 %v4419_v53  ;;  %1300 = vmatprep.mubr.bf16.mxu0 %v4460_v54  ;;  %v4505_v53 = vld [vmem:[%s6046_s2 + $0x2c4] ss:$8 sps:$4 sm:$0xff]   ;;  %v4503_v54 = vld [vmem:[%s6046_s2 + $0x2c0] ss:$8 sps:$4 sm:$0xff]  }
  0x60   : > { %1282 = vmatprep.subr.bf16.mxu0 %v4424_v55  ;;  %v4508_v55 = vld [vmem:[%s6046_s2 + $0x2d4] ss:$8 sps:$4 sm:$0xff]  }
  0x63   : > { %1283 = vmatpush1.bf16.msra.mxu0 %v4422_v56  ;;  %v4506_v56 = vld [vmem:[%s6046_s2 + $0x2d0] ss:$8 sps:$4 sm:$0xff]  }
  0x64   : > { %1284 = vmatprep.subr.bf16.mxu0 %v4427_v57  ;;  %v4514_v57 = vld [vmem:[%s6046_s2 + $0x2e4] ss:$8 sps:$4 sm:$0xff]  }
  0x67   : > { %1285 = vmatpush1.bf16.msra.mxu0 %v4425_v59  ;;  %v4512_v59 = vld [vmem:[%s6046_s2 + $0x2e0] ss:$8 sps:$4 sm:$0xff]  }
  0x68   : > { %1286 = vmatprep.subr.bf16.mxu0 %v4430_v60  ;;  %v4517_v60 = vld [vmem:[%s6046_s2 + $0x2f4] ss:$8 sps:$4 sm:$0xff]  }
  0x6b   : > { %1287 = vmatpush1.bf16.msra.mxu0 %v4428_v61  ;;  %v4515_v61 = vld [vmem:[%s6046_s2 + $0x2f0] ss:$8 sps:$4 sm:$0xff]  }
  0x6c   : > { %1288 = vmatprep.subr.bf16.mxu0 %v4435_v62  ;;  %v4523_v62 = vld [vmem:[%s6046_s2 + $0x304] ss:$8 sps:$4 sm:$0xff]  }
  0x6f   : > { %1289 = vmatpush1.bf16.msra.mxu0 %v4433_v63  ;;  %v4518_v63 = vld [vmem:[%s4965_s24 + $0x10] ss:$28 sps:$4 sm:$0xff]  }
  0x70   : > { %1290 = vmatprep.subr.bf16.mxu0 %v4439_v0  ;;  %v4521_v0 = vld [vmem:[%s6046_s2 + $0x300] ss:$8 sps:$4 sm:$0xff]  }
  0x73   : > { %1291 = vmatpush1.bf16.msra.mxu0 %v4437_v1  ;;  %v4524_v1 = vld [vmem:[%s4965_s24 + $0x4c] ss:$28 sps:$4 sm:$0xff]  }
  0x74   : > { %1292 = vmatprep.subr.bf16.mxu0 %v4444_v2  ;;  %v4526_v2 = vld [vmem:[%s4965_s24 + $0x48] ss:$28 sps:$4 sm:$0xff]  }
  0x77   : > { %1293 = vmatpush1.bf16.msra.mxu0 %v4442_v3  ;;  %v4527_v3 = vld [vmem:[%s4965_s24 + $0x84] ss:$28 sps:$4 sm:$0xff]  }
  0x78   : > { %1294 = vmatprep.subr.bf16.mxu0 %v4448_v4  ;;  %v4529_v4 = vld [vmem:[%s4965_s24 + $0x80] ss:$28 sps:$4 sm:$0xff]  }
  0x7b   : > { %1295 = vmatpush1.bf16.msra.mxu0 %v4446_v5  ;;  %v4530_v5 = vld [vmem:[%s4965_s24 + $0xbc] ss:$28 sps:$4 sm:$0xff]  }
  0x7c   : > { %1296 = vmatprep.subr.bf16.mxu0 %v4453_v6  ;;  %v4532_v6 = vld [vmem:[%s4965_s24 + $0xb8] ss:$28 sps:$4 sm:$0xff]  }
  0x7f   : > { %1297 = vmatpush1.bf16.msra.mxu0 %v4451_v7  ;;  %v4533_v7 = vld [vmem:[%s4965_s24 + $0x18] ss:$28 sps:$4 sm:$0xff]  }
  0x80   : > { %1298 = vmatprep.subr.bf16.mxu0 %v4457_v8  ;;  %v4534_v8 = vld [vmem:[%s4965_s24 + $0x50] ss:$28 sps:$4 sm:$0xff]  }
  0x83   : > { %1299 = vmatpush1.bf16.msra.mxu0 %v4455_v12  ;;  %v4549_v12 = vld [vmem:[%s6047_s3 + $0x70] sm:$0xff]  }
  0x84   : > { %1341 = vmatprep.subr.bf16.mxu0 %v4463_v14  ;;  %4154 = vmatprep.subr.bf16.mxu1 %v4549_v12  ;;  %v4551_v14 = vld [vmem:[%s6047_s3 + $0x78] sm:$0xff]  }
  0x86   : > { %1301 = vmatmul.mubr.bf16.vlgmr.msra.gmra.mrb[0].mxu0 %v4458_v13  ;;  %v4550_v13 = vld [vmem:[%s6047_s3 + $0x30] sm:$0xff]  }
  0x87   : > { %1342 = vmatpush1.bf16.msra.mxu0 %v4461_v15  ;;  %1310 = vmatprep.mubr.bf16.mxu0 %v4491_v16  ;;  %v4552_v15 = vld [vmem:[%s6047_s3 + $0x38] sm:$0xff]   ;;  %v1718_v16 = vld [vmem:[%s6048_s4] sm:$0xff] }
  0x88   : > { %1343 = vmatprep.subr.bf16.mxu0 %v4466_v19  ;;  %4155 = vmatpush3.bf16.msra.mxu1 %v4550_v13  ;;  %v4254_v18 = vpack.c.bf16 %v1719_v17, %v1718_v16  ;;  %v542_v19 = vlaneseq }
  0x89   : > { %4156 = vmatprep.subr.bf16.mxu1 %v4551_v14 }
  0x8a   : > { %v5313_v20 = vshrl.u32 %v542_v19, 7 }
  0x8b   : > { %1344 = vmatpush1.bf16.msra.mxu0 %v4464_v22  ;;  %v405_v22 = vld [vmem:[%s6052_s8] sm:$0x3] }
  0x8c   : > { %1345 = vmatprep.subr.bf16.mxu0 %v4469_v23  ;;  %4157 = vmatpush3.bf16.msra.mxu1 %v4552_v15  ;;  %v5316_v21 = vsub.s32 0, %v5313_v20  ;;  %v5322_v23 = vsub.s32 1, %v5313_v20 }
  0x8d   : > { %4255 = vmatprep.subr.bf16.mxu1 %v4254_v18 }
  0x8e   : > { %1311 = vmatmul.mubr.bf16.gmra.mrb[4].mxu0 %v4493_v25  ;;  %v545_v24 = vrot.slane %v405_v22, %v5316_v21  ;;  %v549_v25 = vrot.slane %v405_v22, %v5322_v23 }
  0x8f   : > { %1346 = vmatpush1.bf16.msra.mxu0 %v4467_v27  ;;  %1320 = vmatprep.mubr.bf16.mxu0 %v4500_v28 }
  0x90   : > { %1347 = vmatprep.subr.bf16.mxu0 %v4472_v29 }
  0x93   : > { %1348 = vmatpush1.bf16.msra.mxu0 %v4470_v32 }
  0x94   : > { %1349 = vmatprep.subr.bf16.mxu0 %v4475_v33 }
  0x96   : > { %1321 = vmatmul.mubr.bf16.gmra.mrb[8].mxu0 %v4502_v34 }
  0x97   : > { %1350 = vmatpush1.bf16.msra.mxu0 %v4473_v35  ;;  %1330 = vmatprep.mubr.bf16.mxu0 %v4509_v36 }
  0x98   : > { %1351 = vmatprep.subr.bf16.mxu0 %v4478_v37 }
  0x9b   : > { %1352 = vmatpush1.bf16.msra.mxu0 %v4476_v38  ;;  %v1720_v38 = vld [vmem:[%s6048_s4 + $0x10] sm:$0xff] }
  0x9c   : > { %1353 = vmatprep.subr.bf16.mxu0 %v4481_v39  ;;  %v1721_v39 = vld [vmem:[%s6048_s4 + $0x18] sm:$0xff] }
  0x9e   : > { %1331 = vmatmul.mubr.bf16.gmra.mrb[12].mxu0 %v4511_v40 }
  0x9f   : > { %1354 = vmatpush1.bf16.msra.mxu0 %v4479_v41  ;;  %1373 = vmatprep.mubr.bf16.mxu0 %v4520_v42 }
  0xa0   : > { %1355 = vmatprep.subr.bf16.mxu0 %v4484_v43 }
  0xa3   : > { %1356 = vmatpush1.bf16.msra.mxu0 %v4482_v44 }
  0xa4   : > { %1357 = vmatprep.subr.bf16.mxu0 %v4487_v45  ;;  %v4258_v45 = vpack.c.bf16 %v1721_v39, %v1720_v38 }
  0xa7   : > { %1358 = vmatpush1.bf16.msra.mxu0 %v4485_v46 }
  0xa8   : > { %1359 = vmatprep.subr.bf16.mxu0 %v4490_v47 }
  0xab   : > { %1360 = vmatpush1.bf16.msra.mxu0 %v4488_v48 }
  0xac   : > { %1361 = vmatprep.subr.bf16.mxu0 %v4496_v49 }
  0xaf   : > { %1362 = vmatpush1.bf16.msra.mxu0 %v4494_v50 }
  0xb0   : > { %1363 = vmatprep.subr.bf16.mxu0 %v4499_v51 }
  0xb3   : > { %1364 = vmatpush1.bf16.msra.mxu0 %v4497_v52 }
  0xb4   : > { %1365 = vmatprep.subr.bf16.mxu0 %v4505_v53 }
  0xb7   : > { %1366 = vmatpush1.bf16.msra.mxu0 %v4503_v54 }
  0xb8   : > { %1367 = vmatprep.subr.bf16.mxu0 %v4508_v55 }
  0xbb   : > { %1368 = vmatpush1.bf16.msra.mxu0 %v4506_v56 }
  0xbc   : > { %1369 = vmatprep.subr.bf16.mxu0 %v4514_v57 }
  0xbf   : > { %1370 = vmatpush1.bf16.msra.mxu0 %v4512_v59 }
  0xc0   : > { %1371 = vmatprep.subr.bf16.mxu0 %v4517_v60 }
  0xc3   : > { %1372 = vmatpush1.bf16.msra.mxu0 %v4515_v61 }
  0xc4   : > { %1414 = vmatprep.subr.bf16.mxu0 %v4523_v62 }
  0xc6   : > { %1374 = vmatmul.mubr.bf16.vlgmr.msra.gmra.mrb[0].mxu0 %v4518_v63 }
  0xc7   : > { %1415 = vmatpush1.bf16.msra.mxu0 %v4521_v0  ;;  %1383 = vmatprep.mubr.bf16.mxu0 %v4524_v1 }
  0xce   : > { %1384 = vmatmul.mubr.bf16.gmra.mrb[4].mxu0 %v4526_v2 }
  0xcf   : > { %1393 = vmatprep.mubr.bf16.mxu0 %v4527_v3 }
  0xd6   : > { %1394 = vmatmul.mubr.bf16.gmra.mrb[8].mxu0 %v4529_v4 }
  0xd7   : > { %1403 = vmatprep.mubr.bf16.mxu0 %v4530_v5 }
  0xde   : > { %1404 = vmatmul.mubr.bf16.gmra.mrb[12].mxu0 %v4532_v6 }
  0xdf   : > { %1446 = vmatprep.mubr.bf16.mxu0 %v4855_v58 }
  0xe6   : > { %3923 = vmatmul.mubr.msk.bf16.vlgmr.msra.gmra.mrb[0].mxu0 %vm1182_vm0, %v4533_v7 }
  0xe7   : > { %1456 = vmatprep.mubr.bf16.mxu0 %v4855_v58 }
  0xee   : > { %3924 = vmatmul.mubr.msk.bf16.gmra.mrb[4].mxu0 %vm1182_vm0, %v4534_v8 }
  0xef   : > { %1466 = vmatprep.mubr.bf16.mxu0 %v4855_v58 }
  0xf6   : > { %3925 = vmatmul.mubr.msk.bf16.gmra.mrb[8].mxu0 %vm1182_vm0, %v4535_v9 }
  0xf7   : > { %1476 = vmatprep.mubr.bf16.mxu0 %v4855_v58 }
  0xfe   : > { %3926 = vmatmul.mubr.msk.bf16.gmra.mrb[12].mxu0 %vm1182_vm0, %v4536_v10 }
 0x1b9   : > { %v1448_v26 = vpop.f32.mrb[0].mxu0 }
 0x1ba   : > { %v4262_v27 = vadd.f32 %v1448_v26, %v545_v24  ;;  %v1450_v28 = vpop.f32.mrb[1].mxu0 }
 0x1bb   : > { %v4263_v29 = vadd.f32 %v1450_v28, %v549_v25  ;;  %v1452_v30 = vpop.f32.mrb[2].mxu0  ;;  %v3927_v28 = vld [vmem:[%s6052_s8 + $0xb] ss:$0 sm:$0xff] }
 0x1bc   : > { %v4264_v31 = vadd.f32 %v1452_v30, %v545_v24  ;;  %v1454_v32 = vpop.f32.mrb[3].mxu0  ;;  %v1487_v34 = vmax.f32 %v4262_v27, 0.0 }
 0x1bd   : > { %v4265_v33 = vadd.f32 %v1454_v32, %v549_v25  ;;  %v1488_v36 = vmax.f32 %v4263_v29, 0.0 }
 0x1be   : > { %v1489_v35 = vmax.f32 %v4264_v31, 0.0 }
 0x1bf   : > { %v1490_v37 = vmax.f32 %v4265_v33, 0.0 }
 0x1c0   : > { %v1503_v40 = vpack.c.bf16 %v1489_v35, %v1487_v34 }
 0x1c1   : > { %v1458_v41 = vpop.f32.mrb[4].mxu0  ;;  %v1504_v42 = vpack.c.bf16 %v1490_v37, %v1488_v36 }
 0x1c2   : > { %v4266_v43 = vadd.f32 %v1458_v41, %v545_v24  ;;  %v1460_v44 = vpop.f32.mrb[5].mxu0 }
 0x1c3   : > { %v4267_v46 = vadd.f32 %v1460_v44, %v549_v25  ;;  %v1462_v47 = vpop.f32.mrb[6].mxu0  ;;  %1677 = vmatprep.mubr.bf16.mxu1 %v1504_v42 }
 0x1c4   : > { %v4268_v48 = vadd.f32 %v1462_v47, %v545_v24  ;;  %v1464_v49 = vpop.f32.mrb[7].mxu0  ;;  %1678 = vmatmul.mubr.bf16.vlgmr.msra.gmra.mrb[0].mxu1 %v1503_v40  ;;  %v1491_v51 = vmax.f32 %v4266_v43, 0.0 }
 0x1c5   : > { %v4269_v50 = vadd.f32 %v1464_v49, %v549_v25  ;;  %4257 = vmatpush3.bf16.msra.mxu1 %v4254_v18  ;;  %v1492_v53 = vmax.f32 %v4267_v46, 0.0 }
 0x1c6   : > { %v1493_v52 = vmax.f32 %v4268_v48, 0.0  ;;  %4259 = vmatprep.subr.bf16.mxu1 %v4258_v45 }
 0x1c7   : > { %v1494_v54 = vmax.f32 %v4269_v50, 0.0 }
 0x1c8   : > { %v1505_v55 = vpack.c.bf16 %v1493_v52, %v1491_v51 }
 0x1c9   : > { %v1506_v56 = vpack.c.bf16 %v1494_v54, %v1492_v53  ;;  %v1468_v57 = vpop.f32.mrb[8].mxu0  ;;  %4261 = vmatpush3.bf16.msra.mxu1 %v4258_v45 }
 0x1ca   : > { %v4270_v59 = vadd.f32 %v1468_v57, %v545_v24  ;;  %v1470_v60 = vpop.f32.mrb[9].mxu0 }
 0x1cb   : > { %v4271_v61 = vadd.f32 %v1470_v60, %v549_v25  ;;  %v1472_v62 = vpop.f32.mrb[10].mxu0  ;;  %1685 = vmatprep.mubr.bf16.mxu1 %v1506_v56 }
 0x1cc   : > { %v4272_v63 = vadd.f32 %v1472_v62, %v545_v24  ;;  %v1474_v0 = vpop.f32.mrb[11].mxu0  ;;  %1686 = vmatmul.mubr.bf16.gmra.mrb[4].mxu1 %v1505_v55  ;;  %v1495_v2 = vmax.f32 %v4270_v59, 0.0 }
 0x1cd   : > { %v4273_v1 = vadd.f32 %v1474_v0, %v549_v25  ;;  %v1496_v4 = vmax.f32 %v4271_v61, 0.0 }
 0x1ce   : > { %v1497_v3 = vmax.f32 %v4272_v63, 0.0 }
 0x1cf   : > { %v1498_v5 = vmax.f32 %v4273_v1, 0.0 }
 0x1d0   : > { %v1507_v6 = vpack.c.bf16 %v1497_v3, %v1495_v2  ;;  %v3944_v3 = vld [vmem:[%s6052_s8 + $0xc] ss:$0 sm:$0xff] }
 0x1d1   : > { %v1508_v7 = vpack.c.bf16 %v1498_v5, %v1496_v4  ;;  %v1478_v8 = vpop.f32.mrb[12].mxu0 }
 0x1d2   : > { %v4274_v9 = vadd.f32 %v1478_v8, %v545_v24  ;;  %v1480_v10 = vpop.f32.mrb[13].mxu0 }
 0x1d3   : > { %v4275_v11 = vadd.f32 %v1480_v10, %v549_v25  ;;  %v1482_v12 = vpop.f32.mrb[14].mxu0  ;;  %1693 = vmatprep.mubr.bf16.mxu1 %v1508_v7 }
 0x1d4   : > { %v4276_v13 = vadd.f32 %v1482_v12, %v545_v24  ;;  %v1484_v14 = vpop.f32.mrb[15].mxu0  ;;  %1694 = vmatmul.mubr.bf16.gmra.mrb[8].mxu1 %v1507_v6  ;;  %v1499_v16 = vmax.f32 %v4274_v9, 0.0 }
 0x1d5   : > { %v4277_v15 = vadd.f32 %v1484_v14, %v549_v25  ;;  %v1500_v18 = vmax.f32 %v4275_v11, 0.0 }
 0x1d6   : > { %v1501_v17 = vmax.f32 %v4276_v13, 0.0 }
 0x1d7   : > { %v1502_v19 = vmax.f32 %v4277_v15, 0.0 }
 0x1d8   : > { %v1509_v22 = vpack.c.bf16 %v1501_v17, %v1499_v16 }
 0x1d9   : > { %v1510_v26 = vpack.c.bf16 %v1502_v19, %v1500_v18 }
 0x1db   : > { %1701 = vmatprep.mubr.bf16.mxu1 %v1510_v26 }
 0x1dc   : > { %1702 = vmatmul.mubr.bf16.gmra.mrb[12].mxu1 %v1509_v22 }
 0x297   : > { %v4158_v27 = vpop.f32.mrb[0].mxu1 }
 0x298   : > { %v4159_v29 = vpop.f32.mrb[1].mxu1 }
 0x299   : > { %v4160_v30 = vadd.f32 %v4159_v29, %v4158_v27  ;;  %v4161_v31 = vpop.f32.mrb[2].mxu1 }
 0x29a   : > { %v4162_v24 = vpop.f32.mrb[3].mxu1 }
 0x29b   : > { %v1680_v32 = vadd.f32 %v4160_v30, %v3927_v28  ;;  %v4163_v33 = vadd.f32 %v4162_v24, %v4161_v31 }
 0x29d   : > { %v1710_v25 = vmax.f32 %v1680_v32, 0.0  ;;  %v1683_v34 = vadd.f32 %v4163_v33, %v3927_v28 }
 0x29f   : > { %v1711_v35 = vmax.f32 %v1683_v34, 0.0  ;;  %v4164_v36 = vpop.f32.mrb[4].mxu1  ;;  %4242 = vmatprep.mubr.msk.f32.mxu1 %vm1728_vm1, %v1710_v25 }
 0x2a0   : > { %v4165_v37 = vpop.f32.mrb[5].mxu1 }
 0x2a1   : > { %v4166_v38 = vadd.f32 %v4165_v37, %v4164_v36  ;;  %v4167_v39 = vpop.f32.mrb[6].mxu1  ;;  %4243 = vmatmul.mubr.msk.f32.vlgmr.msra.gmra.mrb[16].mxu1 %vm1728_vm1, %v1711_v35 }
 0x2a2   : > { %v4168_v40 = vpop.f32.mrb[7].mxu1 }
 0x2a3   : > { %v1688_v41 = vadd.f32 %v4166_v38, %v3927_v28  ;;  %v4169_v42 = vadd.f32 %v4168_v40, %v4167_v39 }
 0x2a5   : > { %v1712_v43 = vmax.f32 %v1688_v41, 0.0  ;;  %v1691_v44 = vadd.f32 %v4169_v42, %v3927_v28 }
 0x2a7   : > { %v1713_v45 = vmax.f32 %v1691_v44, 0.0  ;;  %v4170_v46 = vpop.f32.mrb[8].mxu1  ;;  %4245 = vmatprep.mubr.msk.f32.mxu1 %vm1728_vm1, %v1712_v43 }
 0x2a8   : > { %v4171_v47 = vpop.f32.mrb[9].mxu1 }
 0x2a9   : > { %v4172_v48 = vadd.f32 %v4171_v47, %v4170_v46  ;;  %v4173_v49 = vpop.f32.mrb[10].mxu1  ;;  %4246 = vmatmul.mubr.msk.f32.gmra.mrb[18].mxu1 %vm1728_vm1, %v1713_v45  ;;  %v1858_v47 = vld [vmem:[%s5416_s23] sm:$0xff] }
 0x2aa   : > { %v4174_v50 = vpop.f32.mrb[11].mxu1 }
 0x2ab   : > { %v1696_v51 = vadd.f32 %v4172_v48, %v3927_v28  ;;  %v4175_v52 = vadd.f32 %v4174_v50, %v4173_v49  ;;  %v1859_v50 = vld [vmem:[%s5416_s23 + $0x8] sm:$0xff] }
 0x2ad   : > { %v1714_v53 = vmax.f32 %v1696_v51, 0.0  ;;  %v1699_v54 = vadd.f32 %v4175_v52, %v3927_v28 }
 0x2af   : > { %v1715_v55 = vmax.f32 %v1699_v54, 0.0  ;;  %v4176_v56 = vpop.f32.mrb[12].mxu1  ;;  %4248 = vmatprep.mubr.msk.f32.mxu1 %vm1728_vm1, %v1714_v53  ;;  %v4553_v54 = vld [vmem:[%s6050_s6] ss:$8 sps:$4 sm:$0xff]  }
 0x2b0   : > { %v4177_v57 = vpop.f32.mrb[13].mxu1 }
 0x2b1   : > { %v4178_v59 = vadd.f32 %v4177_v57, %v4176_v56  ;;  %v4179_v60 = vpop.f32.mrb[14].mxu1  ;;  %4249 = vmatmul.mubr.msk.f32.gmra.mrb[20].mxu1 %vm1728_vm1, %v1715_v55  ;;  %v4555_v55 = vld [vmem:[%s6050_s6 + $0x4] ss:$8 sps:$4 sm:$0xff]   ;;  %v1860_v56 = vld [vmem:[%s5416_s23 + $0x10] sm:$0xff] }
 0x2b2   : > { %v4180_v61 = vpop.f32.mrb[15].mxu1  ;;  %2117 = vmatprep.subr.bf16.mxu1 %v4555_v55 }
 0x2b3   : > { %v1704_v62 = vadd.f32 %v4178_v59, %v3927_v28  ;;  %v4181_v63 = vadd.f32 %v4180_v61, %v4179_v60  ;;  %2118 = vmatpush1.bf16.msra.mxu1 %v4553_v54  ;;  %v4857_v61 = vmov 1   ;;  %v4559_v54 = vld [vmem:[%s6051_s7] ss:$28 sps:$4 sm:$0xff]  }
 0x2b5   : > { %v1716_v0 = vmax.f32 %v1704_v62, 0.0  ;;  %v1707_v1 = vadd.f32 %v4181_v63, %v3927_v28  ;;  %v1861_v62 = vld [vmem:[%s5416_s23 + $0x18] sm:$0xff] }
 0x2b7   : > { %v1717_v2 = vmax.f32 %v1707_v1, 0.0  ;;  %4251 = vmatprep.mubr.msk.f32.mxu1 %vm1728_vm1, %v1716_v0 }
 0x2b9   : > { %4252 = vmatmul.mubr.msk.f32.gmra.mrb[22].mxu1 %vm1728_vm1, %v1717_v2  ;;  %v1863_v2 = vld [vmem:[%s5416_s23 + $0x28] sm:$0xff] }
 0x2ba   : > { %2149 = vmatprep.mubr.bf16.mxu1 %v4855_v58 }
 0x374   : > { %v4244_v4 = vpop.f32.mrb[16].mxu1 }
 0x375   : > { %v5355_v5 = vadd.f32 %v4244_v4, %v3944_v3  ;;  %v1819_v6 = vpop.f32.mrb[17].mxu1 }
 0x376   : > { %v5357_v7 = vadd.f32 %v3944_v3, %v1819_v6  ;;  %v1862_v6 = vld [vmem:[%s5416_s23 + $0x20] sm:$0xff] }
 0x377   : > { %3673 = vst.msk [vmem:[%s5353_s19 + $0x8] sm:$0xff] %vm3671_vm2, %v5355_v5  ;;  %v1867_v8 = vmul.f32 0.5, %v5355_v5 }
 0x378   : > { %v1866_v9 = vmul.f32 0.5, %v5357_v7  ;;  %3672 = vst.msk [vmem:[%s5353_s19] sm:$0xff] %vm3671_vm2, %v5357_v7 }
 0x379   : > { %v1876_v11 = vmul.f32 1.442695, %v1867_v8  ;;  %v4558_v8 = vld [vmem:[%s6050_s6 + $0x14] ss:$8 sps:$4 sm:$0xff]  }
 0x37a   : > { %v1874_v10 = vmul.f32 1.442695, %v1866_v9  ;;  %2119 = vmatprep.subr.bf16.mxu1 %v4558_v8 }
 0x37c   : > { %4719 = vpow2.f32 %v1874_v10  ;;  %v4247_v12 = vpop.f32.mrb[18].mxu1  ;;  %v4556_v10 = vld [vmem:[%s6050_s6 + $0x10] ss:$8 sps:$4 sm:$0xff]  }
 0x37d   : > { %v5367_v13 = vadd.f32 %v4247_v12, %v3944_v3  ;;  %v1829_v14 = vpop.f32.mrb[19].mxu1  ;;  %4721 = vpow2.f32 %v1876_v11  ;;  %2120 = vmatpush1.bf16.msra.mxu1 %v4556_v10  ;;  %v1864_v12 = vld [vmem:[%s5416_s23 + $0x30] sm:$0xff] }
 0x37e   : > { %v5369_v15 = vadd.f32 %v3944_v3, %v1829_v14 }
 0x37f   : > { %3675 = vst.msk [vmem:[%s5353_s19 + $0x18] sm:$0xff] %vm3671_vm2, %v5367_v13  ;;  %v1869_v16 = vmul.f32 0.5, %v5367_v13 }
 0x380   : > { %v1868_v17 = vmul.f32 0.5, %v5369_v15  ;;  %3674 = vst.msk [vmem:[%s5353_s19 + $0x10] sm:$0xff] %vm3671_vm2, %v5369_v15 }
 0x381   : > { %v1880_v19 = vmul.f32 1.442695, %v1869_v16 }
 0x382   : > { %v1878_v18 = vmul.f32 1.442695, %v1868_v17  ;;  %v1865_v17 = vld [vmem:[%s5416_s23 + $0x38] sm:$0xff] }
 0x384   : > { %4723 = vpow2.f32 %v1878_v18  ;;  %v4250_v22 = vpop.f32.mrb[20].mxu1 }
 0x385   : > { %v5379_v26 = vadd.f32 %v4250_v22, %v3944_v3  ;;  %v1839_v27 = vpop.f32.mrb[21].mxu1  ;;  %4725 = vpow2.f32 %v1880_v19 }
 0x386   : > { %v4720_v28 = vpop.eup %4719  ;;  %v5381_v29 = vadd.f32 %v3944_v3, %v1839_v27  ;;  %v4586_v27 = vld [vmem:[%s6051_s7 + $0x1d8] ss:$28 sps:$4 sm:$0xff]  }
 0x387   : > { %v1871_v30 = vmul.f32 0.5, %v5379_v26  ;;  %3677 = vst.msk [vmem:[%s5353_s19 + $0x28] sm:$0xff] %vm3671_vm2, %v5379_v26  ;;  %1898 = vrot.lane.b32.xlu0 %v4720_v28, %s4856_s20  ;;  %v4722_v32 = vpop.eup %4721  ;;  %v4587_v28 = vld [vmem:[%s6051_s7 + $0x18] ss:$28 sps:$4 sm:$0xff]   ;;  %4194 = vmatprep.subr.bf16.mxu0 %v4586_v27 }
 0x388   : > { %v1870_v31 = vmul.f32 0.5, %v5381_v29  ;;  %3676 = vst.msk [vmem:[%s5353_s19 + $0x20] sm:$0xff] %vm3671_vm2, %v5381_v29  ;;  %4195 = vmatpush3.bf16.msra.mxu0 %v4587_v28 }
 0x389   : > { %v1884_v24 = vmul.f32 1.442695, %v1871_v30  ;;  %v4592_v30 = vld [vmem:[%s6051_s7 + $0x50] ss:$28 sps:$4 sm:$0xff]  }
 0x38a   : > { %v1882_v33 = vmul.f32 1.442695, %v1870_v31  ;;  %v4596_v31 = vld [vmem:[%s6051_s7 + $0x248] ss:$28 sps:$4 sm:$0xff]  }
 0x38b   : > { %4727 = vpow2.f32 %v1884_v24  ;;  %1900 = vrot.lane.b32.xlu0 %v4722_v32, %s4856_s20  ;;  %v4597_v24 = vld [vmem:[%s6051_s7 + $0x88] ss:$28 sps:$4 sm:$0xff]   ;;  %v4601_v32 = vld [vmem:[%s6051_s7 + $0x280] ss:$28 sps:$4 sm:$0xff]  }
 0x38c   : > { %4729 = vpow2.f32 %v1882_v33  ;;  %v4253_v25 = vpop.f32.mrb[22].mxu1  ;;  %v4602_v33 = vld [vmem:[%s6051_s7 + $0xc0] ss:$28 sps:$4 sm:$0xff]  }
 0x38d   : > { %v5393_v34 = vadd.f32 %v4253_v25, %v3944_v3  ;;  %v1849_v35 = vpop.f32.mrb[23].mxu1  ;;  %v4606_v25 = vld [vmem:[%s6051_s7 + $0x2b8] ss:$28 sps:$4 sm:$0xff]  }
 0x38e   : > { %v4724_v36 = vpop.eup %4723  ;;  %v5395_v37 = vadd.f32 %v3944_v3, %v1849_v35  ;;  %v4611_v35 = vld [vmem:[%s6051_s7 + $0x2f0] ss:$28 sps:$4 sm:$0xff]  }
 0x38f   : > { %v1873_v38 = vmul.f32 0.5, %v5393_v34  ;;  %3679 = vst.msk [vmem:[%s5353_s19 + $0x38] sm:$0xff] %vm3671_vm2, %v5393_v34  ;;  %1902 = vrot.lane.b32.xlu1 %v4724_v36, %s4856_s20  ;;  %v4726_v41 = vpop.eup %4725 }
 0x390   : > { %v1872_v39 = vmul.f32 0.5, %v5395_v37  ;;  %3678 = vst.msk [vmem:[%s5353_s19 + $0x30] sm:$0xff] %vm3671_vm2, %v5395_v37 }
 0x391   : > { %v1888_v40 = vmul.f32 1.442695, %v1873_v38  ;;  %v5494_v38 = vld [vmem:[%s6049_s5] ss:$0 sm:$0xff] }
 0x392   : > { %v1886_v42 = vmul.f32 1.442695, %v1872_v39 }
 0x393   : > { %4731 = vpow2.f32 %v1888_v40  ;;  %1904 = vrot.lane.b32.xlu1 %v4726_v41, %s4856_s20 }
 0x394   : > { %4733 = vpow2.f32 %v1886_v42 }
 0x395   : > { %v4728_v43 = vpop.eup %4727 }
 0x396   : > { %v4730_v44 = vpop.eup %4729 }
 0x397   : > { %1908 = vrot.lane.b32.xlu1 %v4728_v43, %s4856_s20  ;;  %1906 = vrot.lane.b32.xlu0 %v4730_v44, %s4856_s20  ;;  %v5501_v44 = vld [vmem:[%s6052_s8 + $0xd] ss:$0 sm:$0xff] }
 0x39d   : > { %v4732_v45 = vpop.eup %4731 }
 0x39e   : > { %v4734_v46 = vpop.eup %4733  ;;  %1912 = vrot.lane.b32.xlu1 %v4732_v45, %s4856_s20 }
 0x39f   : > { %1910 = vrot.lane.b32.xlu0 %v4734_v46, %s4856_s20 }
 0x3f9   : > { %v1899_v48 = vpop.permute.xlu0 %1898 }
 0x3fa   : > { %v1922_v49 = vmul.f32 %v1899_v48, %v1858_v47 }
 0x3fc   : > { %v1930_v51 = vadd.f32 %v1922_v49, %v5357_v7 }
 0x3fd   : > { %v1901_v52 = vpop.permute.xlu0 %1900 }
 0x3fe   : > { %v1923_v53 = vmul.f32 %v1901_v52, %v1859_v50  ;;  %1941 = vperm.xlu0 %4339, %v1930_v51  }
 0x400   : > { %v1931_v57 = vadd.f32 %v1923_v53, %v5355_v5 }
 0x401   : > { %v1903_v59 = vpop.permute.xlu1 %1902 }
 0x402   : > { %v1924_v60 = vmul.f32 %v1903_v59, %v1860_v56  ;;  %4341 = vset.pattern.permute.xlu0 %v4857_v61  ;;  %1946 = vperm.xlu1 %4338, %v1931_v57   ;;  %v4564_v56 = vld [vmem:[%s6051_s7 + $0x3c] ss:$28 sps:$4 sm:$0xff]  }
 0x403   : > { %1997 = vperm.xlu0 %4341, %v1931_v57  }
 0x404   : > { %v1932_v63 = vadd.f32 %v1924_v60, %v5369_v15 }
 0x405   : > { %v1905_v0 = vpop.permute.xlu1 %1904 }
 0x406   : > { %v1925_v1 = vmul.f32 %v1905_v0, %v1861_v62  ;;  %4340 = vset.pattern.permute.xlu1 %v4857_v61  ;;  %v4562_v62 = vld [vmem:[%s6051_s7 + $0x38] ss:$28 sps:$4 sm:$0xff]  }
 0x407   : > { %2001 = vperm.xlu0 %4341, %v1932_v63   ;;  %1993 = vperm.xlu1 %4340, %v1930_v51  }
 0x408   : > { %v1933_v4 = vadd.f32 %v1925_v1, %v5367_v13 }
 0x409   : > { %v1909_v3 = vpop.permute.xlu1 %1908  ;;  %v1907_v7 = vpop.permute.xlu0 %1906 }
 0x40a   : > { %v1927_v5 = vmul.f32 %v1909_v3, %v1863_v2  ;;  %v1926_v11 = vmul.f32 %v1907_v7, %v1862_v6  ;;  %v4570_v6 = vld [vmem:[%s6051_s7 + $0xac] ss:$28 sps:$4 sm:$0xff]  }
 0x40b   : > { %4342 = vset.pattern.permute.xlu1 %v4855_v58 }
 0x40c   : > { %v1935_v9 = vadd.f32 %v1927_v5, %v5379_v26  ;;  %1956 = vperm.xlu1 %4342, %v1933_v4   ;;  %v1934_v13 = vadd.f32 %v1926_v11, %v5381_v29  ;;  %v4561_v26 = vld [vmem:[%s6051_s7 + $0x4] ss:$28 sps:$4 sm:$0xff]   ;;  %v4591_v29 = vld [vmem:[%s6051_s7 + $0x210] ss:$28 sps:$4 sm:$0xff]  }
 0x40d   : > { %2954 = vmatprep.subr.bf16.mxu1 %v4561_v26  ;;  %4196 = vmatprep.subr.bf16.mxu0 %v4591_v29  ;;  %v4565_v5 = vld [vmem:[%s6051_s7 + $0x70] ss:$28 sps:$4 sm:$0xff]   ;;  %v4571_v26 = vld [vmem:[%s6051_s7 + $0xe0] ss:$28 sps:$4 sm:$0xff]  }
 0x40e   : > { %2013 = vperm.xlu0 %4341, %v1935_v9   ;;  %4197 = vmatpush3.bf16.msra.mxu0 %v4592_v30  ;;  %v4576_v29 = vld [vmem:[%s6051_s7 + $0x11c] ss:$28 sps:$4 sm:$0xff]  }
 0x40f   : > { %4198 = vmatprep.subr.bf16.mxu0 %v4596_v31 }
 0x410   : > { %4343 = vset.pattern.permute.xlu1 %v4857_v61  ;;  %v1913_v18 = vpop.permute.xlu1 %1912 }
 0x411   : > { %2005 = vperm.xlu1 %4343, %v1933_v4   ;;  %v1911_v14 = vpop.permute.xlu0 %1910  ;;  %v1929_v19 = vmul.f32 %v1913_v18, %v1865_v17 }
 0x412   : > { %v1928_v15 = vmul.f32 %v1911_v14, %v1864_v12  ;;  %4345 = vset.pattern.permute.xlu0 %v4855_v58  ;;  %4199 = vmatpush3.bf16.msra.mxu0 %v4597_v24  ;;  %v4568_v12 = vld [vmem:[%s6051_s7 + $0xa8] ss:$28 sps:$4 sm:$0xff]   ;;  %v4574_v24 = vld [vmem:[%s6051_s7 + $0x118] ss:$28 sps:$4 sm:$0xff]  }
 0x413   : > { %1961 = vperm.xlu0 %4345, %v1934_v13   ;;  %v1937_v22 = vadd.f32 %v1929_v19, %v5393_v34  ;;  %4200 = vmatprep.subr.bf16.mxu0 %v4601_v32  ;;  %v4607_v34 = vld [vmem:[%s6051_s7 + $0xf8] ss:$28 sps:$4 sm:$0xff]   ;;  %v4573_v14 = vld [vmem:[%s6051_s7 + $0xe4] ss:$28 sps:$4 sm:$0xff]  }
 0x414   : > { %v1936_v16 = vadd.f32 %v1928_v15, %v5395_v37  ;;  %v5489_v37 = vld [vmem:[%s6049_s5 + $0x1] ss:$0 sm:$0xff] }
 0x415   : > { %4344 = vset.pattern.permute.xlu1 %v4855_v58 }
 0x416   : > { %1951 = vperm.xlu1 %4344, %v1932_v63   ;;  %4201 = vmatpush3.bf16.msra.mxu0 %v4602_v33  ;;  %v4567_v63 = vld [vmem:[%s6051_s7 + $0x74] ss:$28 sps:$4 sm:$0xff]  }
 0x417   : > { %4348 = vset.pattern.permute.xlu0 %v4857_v61  ;;  %4202 = vmatprep.subr.bf16.mxu0 %v4606_v25  ;;  %v4579_v25 = vld [vmem:[%s6051_s7 + $0x154] ss:$28 sps:$4 sm:$0xff]  }
 0x418   : > { %2017 = vperm.xlu0 %4348, %v1936_v16  }
 0x41a   : > { %1966 = vperm.xlu1 %4344, %v1935_v9   ;;  %4203 = vmatpush3.bf16.msra.mxu0 %v4607_v34 }
 0x41b   : > { %4204 = vmatprep.subr.bf16.mxu0 %v4611_v35 }
 0x41e   : > { %4346 = vset.pattern.permute.xlu1 %v4857_v61 }
 0x41f   : > { %2009 = vperm.xlu1 %4346, %v1934_v13  }
 0x423   : > { %4347 = vset.pattern.permute.xlu1 %v4855_v58 }
 0x424   : > { %1976 = vperm.xlu1 %4347, %v1937_v22  }
 0x428   : > { %1971 = vperm.xlu1 %4347, %v1936_v16  }
 0x42c   : > { %4349 = vset.pattern.permute.xlu1 %v4857_v61 }
 0x42d   : > { %2021 = vperm.xlu1 %4349, %v1937_v22  }
 0x47d   : > { %v1942_v36 = vpop.permute.xlu0 %1941 }
 0x47e   : > { %v1983_v46 = vmul.f32 %v5494_v38, %v1942_v36 }
 0x481   : > { %v1947_v39 = vpop.permute.xlu1 %1946 }
 0x482   : > { %v1984_v40 = vmul.f32 %v5494_v38, %v1947_v39  ;;  %v1998_v41 = vpop.permute.xlu0 %1997  ;;  %v4577_v39 = vld [vmem:[%s6051_s7 + $0x150] ss:$28 sps:$4 sm:$0xff]  }
 0x483   : > { %v2029_v42 = vmul.f32 %v5489_v37, %v1998_v41 }
 0x485   : > { %v2037_v43 = vadd.f32 %v2029_v42, %v1984_v40  ;;  %v4582_v42 = vld [vmem:[%s6051_s7 + $0x18c] ss:$28 sps:$4 sm:$0xff]  }
 0x486   : > { %v1994_v45 = vpop.permute.xlu1 %1993  ;;  %v2002_v60 = vpop.permute.xlu0 %2001 }
 0x487   : > { %v2028_v47 = vmul.f32 %v5489_v37, %v1994_v45  ;;  %v2051_v48 = vadd.f32 %v5501_v44, %v2037_v43  ;;  %v2030_v2 = vmul.f32 %v5489_v37, %v2002_v60  ;;  %v4593_v60 = vld [vmem:[%s6051_s7 + $0x230] ss:$28 sps:$4 sm:$0xff]  }
 0x489   : > { %v2036_v49 = vadd.f32 %v2028_v47, %v1983_v46  ;;  %v2059_v52 = vmax.f32 %v2051_v48, 0.0  ;;  %v4580_v46 = vld [vmem:[%s6051_s7 + $0x188] ss:$28 sps:$4 sm:$0xff]  }
 0x48a   : > { %v4585_v48 = vld [vmem:[%s6051_s7 + $0x1c4] ss:$28 sps:$4 sm:$0xff]  }
 0x48b   : > { %v2050_v50 = vadd.f32 %v5501_v44, %v2036_v49  ;;  %v1957_v51 = vpop.permute.xlu1 %1956 }
 0x48c   : > { %v1986_v61 = vmul.f32 %v5494_v38, %v1957_v51 }
 0x48d   : > { %v2058_v53 = vmax.f32 %v2050_v50, 0.0  ;;  %v2014_v3 = vpop.permute.xlu0 %2013 }
 0x48e   : > { %v2033_v13 = vmul.f32 %v5489_v37, %v2014_v3  ;;  %v4615_v3 = vld [vmem:[%s6051_s7 + $0x314] ss:$28 sps:$4 sm:$0xff]  }
 0x48f   : > { %v2066_v55 = vpack.c.bf16 %v2059_v52, %v2058_v53 }
 0x490   : > { %v2006_v57 = vpop.permute.xlu1 %2005 }
 0x491   : > { %v2031_v59 = vmul.f32 %v5489_v37, %v2006_v57  ;;  %3960 = vmatmul.mubr.msk.bf16.vlgmr.msra.gmra.mrb[24].mxu1 %vm1728_vm1, %v2066_v55  ;;  %v4595_v57 = vld [vmem:[%s6051_s7 + $0x234] ss:$28 sps:$4 sm:$0xff]  }
 0x492   : > { %2159 = vmatprep.mubr.bf16.mxu1 %v4855_v58  ;;  %2955 = vmatpush1.bf16.msra.mxu1 %v4559_v54  ;;  %v1962_v16 = vpop.permute.xlu0 %1961  ;;  %v4590_v54 = vld [vmem:[%s6051_s7 + $0x1fc] ss:$28 sps:$4 sm:$0xff]  }
 0x493   : > { %2956 = vmatprep.subr.bf16.mxu1 %v4564_v56  ;;  %v2039_v0 = vadd.f32 %v2031_v59, %v1986_v61  ;;  %v1987_v27 = vmul.f32 %v5494_v38, %v1962_v16  ;;  %v4598_v61 = vld [vmem:[%s6051_s7 + $0x268] ss:$28 sps:$4 sm:$0xff]  }
 0x495   : > { %v1952_v1 = vpop.permute.xlu1 %1951  ;;  %v2053_v7 = vadd.f32 %v5501_v44, %v2039_v0  ;;  %v4610_v0 = vld [vmem:[%s6051_s7 + $0x2dc] ss:$28 sps:$4 sm:$0xff]  }
 0x496   : > { %v1985_v4 = vmul.f32 %v5494_v38, %v1952_v1  ;;  %2957 = vmatpush1.bf16.msra.mxu1 %v4562_v62  ;;  %v4605_v62 = vld [vmem:[%s6051_s7 + $0x2a4] ss:$28 sps:$4 sm:$0xff]   ;;  %v4608_v1 = vld [vmem:[%s6051_s7 + $0x2d8] ss:$28 sps:$4 sm:$0xff]  }
 0x497   : > { %2958 = vmatprep.subr.bf16.mxu1 %v4567_v63  ;;  %v2061_v15 = vmax.f32 %v2053_v7, 0.0  ;;  %v2018_v36 = vpop.permute.xlu0 %2017  ;;  %v4603_v63 = vld [vmem:[%s6051_s7 + $0x2a0] ss:$28 sps:$4 sm:$0xff]   ;;  %v4620_v7 = vld [vmem:[%s6051_s7 + $0x34c] ss:$28 sps:$4 sm:$0xff]  }
 0x498   : > { %v2038_v8 = vadd.f32 %v2030_v2, %v1985_v4  ;;  %v2034_v45 = vmul.f32 %v5489_v37, %v2018_v36  ;;  %v4612_v2 = vld [vmem:[%s6051_s7 + $0x130] ss:$28 sps:$4 sm:$0xff]  }
 0x499   : > { %v1967_v9 = vpop.permute.xlu1 %1966  ;;  %4205 = vmatpush3.bf16.msra.mxu0 %v4612_v2  ;;  %v4613_v4 = vld [vmem:[%s6051_s7 + $0x310] ss:$28 sps:$4 sm:$0xff]  }
 0x49a   : > { %v2052_v10 = vadd.f32 %v5501_v44, %v2038_v8  ;;  %v1988_v11 = vmul.f32 %v5494_v38, %v1967_v9  ;;  %2959 = vmatpush1.bf16.msra.mxu1 %v4565_v5  ;;  %v4616_v5 = vld [vmem:[%s6051_s7 + $0x328] ss:$28 sps:$4 sm:$0xff]   ;;  %v4621_v9 = vld [vmem:[%s6051_s7 + $0x360] ss:$28 sps:$4 sm:$0xff]  }
 0x49b   : > { %2960 = vmatprep.subr.bf16.mxu1 %v4570_v6  ;;  %v4617_v6 = vld [vmem:[%s6051_s7 + $0x168] ss:$28 sps:$4 sm:$0xff]   ;;  %4206 = vmatprep.subr.bf16.mxu0 %v4616_v5 }
 0x49c   : > { %v2060_v17 = vmax.f32 %v2052_v10, 0.0  ;;  %v2041_v18 = vadd.f32 %v2033_v13, %v1988_v11  ;;  %v4618_v8 = vld [vmem:[%s6051_s7 + $0x348] ss:$28 sps:$4 sm:$0xff]   ;;  %v4622_v10 = vld [vmem:[%s6051_s7 + $0x1a0] ss:$28 sps:$4 sm:$0xff]  }
 0x49d   : > { %4207 = vmatpush3.bf16.msra.mxu0 %v4617_v6  ;;  %v4625_v11 = vld [vmem:[%s6051_s7 + $0xc] ss:$28 sps:$4 sm:$0xff]  }
 0x49e   : > { %v2067_v19 = vpack.c.bf16 %v2061_v15, %v2060_v17  ;;  %v2010_v22 = vpop.permute.xlu1 %2009  ;;  %2961 = vmatpush1.bf16.msra.mxu1 %v4568_v12  ;;  %v2055_v30 = vadd.f32 %v5501_v44, %v2041_v18  ;;  %4208 = vmatprep.subr.bf16.mxu0 %v4621_v9  ;;  %v409_v12 = vld [vmem:[%s6052_s8 + $0x2] sm:$0x3]  ;;  %v4646_v9 = vld [vmem:[%s6051_s7 + $0x194] ss:$28 sps:$4 sm:$0xff]  }
 0x49f   : > { %v2032_v28 = vmul.f32 %v5489_v37, %v2010_v22  ;;  %2962 = vmatprep.subr.bf16.mxu1 %v4573_v14  ;;  %v5647_v13 = vrot.slane %v409_v12, %v5316_v21  ;;  %v5650_v14 = vrot.slane %v409_v12, %v5322_v23 }
 0x4a0   : > { %3961 = vmatmul.mubr.msk.bf16.gmra.mrb[28].mxu1 %vm1728_vm1, %v2067_v19  ;;  %v2063_v34 = vmax.f32 %v2055_v30, 0.0 }
 0x4a1   : > { %v2040_v31 = vadd.f32 %v2032_v28, %v1987_v27  ;;  %2169 = vmatprep.mubr.bf16.mxu1 %v4855_v58  ;;  %4209 = vmatpush3.bf16.msra.mxu0 %v4622_v10  ;;  %v4644_v10 = vld [vmem:[%s6051_s7 + $0x190] ss:$28 sps:$4 sm:$0xff]  }
 0x4a2   : > { %2963 = vmatpush1.bf16.msra.mxu1 %v4571_v26 }
 0x4a3   : > { %v2054_v32 = vadd.f32 %v5501_v44, %v2040_v31  ;;  %v1977_v33 = vpop.permute.xlu1 %1976  ;;  %2964 = vmatprep.subr.bf16.mxu1 %v4576_v29 }
 0x4a4   : > { %v1990_v50 = vmul.f32 %v5494_v38, %v1977_v33  ;;  %v4623_v33 = vld [vmem:[%s6051_s7 + $0x8] ss:$28 sps:$4 sm:$0xff]  }
 0x4a5   : > { %v2062_v35 = vmax.f32 %v2054_v32, 0.0 }
 0x4a6   : > { %2965 = vmatpush1.bf16.msra.mxu1 %v4574_v24 }
 0x4a7   : > { %v2068_v40 = vpack.c.bf16 %v2063_v34, %v2062_v35  ;;  %v1972_v41 = vpop.permute.xlu1 %1971  ;;  %2966 = vmatprep.subr.bf16.mxu1 %v4579_v25  ;;  %v4628_v25 = vld [vmem:[%s6051_s7 + $0x44] ss:$28 sps:$4 sm:$0xff]   ;;  %v4631_v35 = vld [vmem:[%s6051_s7 + $0x7c] ss:$28 sps:$4 sm:$0xff]  }
 0x4a8   : > { %v1989_v43 = vmul.f32 %v5494_v38, %v1972_v41  ;;  %v4626_v34 = vld [vmem:[%s6051_s7 + $0x40] ss:$28 sps:$4 sm:$0xff]   ;;  %v4629_v41 = vld [vmem:[%s6051_s7 + $0x78] ss:$28 sps:$4 sm:$0xff]  }
 0x4a9   : > { %3962 = vmatmul.mubr.msk.bf16.gmra.mrb[32].mxu1 %vm1728_vm1, %v2068_v40 }
 0x4aa   : > { %2179 = vmatprep.mubr.bf16.mxu1 %v4855_v58  ;;  %2967 = vmatpush1.bf16.msra.mxu1 %v4577_v39  ;;  %v2042_v47 = vadd.f32 %v2034_v45, %v1989_v43  ;;  %v4583_v58 = vld [vmem:[%s6051_s7 + $0x1c0] ss:$28 sps:$4 sm:$0xff]   ;;  %v4634_v45 = vld [vmem:[%s6051_s7 + $0xb4] ss:$28 sps:$4 sm:$0xff]  }
 0x4ab   : > { %2968 = vmatprep.subr.bf16.mxu1 %v4582_v42 }
 0x4ac   : > { %v2022_v49 = vpop.permute.xlu1 %2021  ;;  %v2056_v52 = vadd.f32 %v5501_v44, %v2042_v47 }
 0x4ad   : > { %v2035_v51 = vmul.f32 %v5489_v37, %v2022_v49  ;;  %v4588_v37 = vld [vmem:[%s6051_s7 + $0x1f8] ss:$28 sps:$4 sm:$0xff]  }
 0x4ae   : > { %2969 = vmatpush1.bf16.msra.mxu1 %v4580_v46  ;;  %v2064_v38 = vmax.f32 %v2056_v52, 0.0 }
 0x4af   : > { %v2043_v53 = vadd.f32 %v2035_v51, %v1990_v50  ;;  %2970 = vmatprep.subr.bf16.mxu1 %v4585_v48  ;;  %v4632_v51 = vld [vmem:[%s6051_s7 + $0xb0] ss:$28 sps:$4 sm:$0xff]  }
 0x4b1   : > { %v2057_v55 = vadd.f32 %v5501_v44, %v2043_v53  ;;  %v4600_v44 = vld [vmem:[%s6051_s7 + $0x26c] ss:$28 sps:$4 sm:$0xff]  }
 0x4b2   : > { %2971 = vmatpush1.bf16.msra.mxu1 %v4583_v58 }
 0x4b3   : > { %v2065_v56 = vmax.f32 %v2057_v55, 0.0  ;;  %2972 = vmatprep.subr.bf16.mxu1 %v4590_v54  ;;  %v4637_v54 = vld [vmem:[%s6051_s7 + $0xec] ss:$28 sps:$4 sm:$0xff]  }
 0x4b5   : > { %v2069_v59 = vpack.c.bf16 %v2065_v56, %v2064_v38  ;;  %v4635_v38 = vld [vmem:[%s6051_s7 + $0xe8] ss:$28 sps:$4 sm:$0xff]  }
 0x4b6   : > { %2973 = vmatpush1.bf16.msra.mxu1 %v4588_v37 }
 0x4b7   : > { %3963 = vmatmul.mubr.msk.bf16.gmra.mrb[36].mxu1 %vm1728_vm1, %v2069_v59  ;;  %2974 = vmatprep.subr.bf16.mxu1 %v4595_v57  ;;  %v4640_v59 = vld [vmem:[%s6051_s7 + $0x124] ss:$28 sps:$4 sm:$0xff]  }
 0x4ba   : > { %2975 = vmatpush1.bf16.msra.mxu1 %v4593_v60 }
 0x4bb   : > { %2976 = vmatprep.subr.bf16.mxu1 %v4600_v44 }
 0x4be   : > { %2977 = vmatpush1.bf16.msra.mxu1 %v4598_v61 }
 0x4bf   : > { %2978 = vmatprep.subr.bf16.mxu1 %v4605_v62 }
 0x4c2   : > { %2979 = vmatpush1.bf16.msra.mxu1 %v4603_v63 }
 0x4c3   : > { %2980 = vmatprep.subr.bf16.mxu1 %v4610_v0  ;;  %v4638_v0 = vld [vmem:[%s6051_s7 + $0x120] ss:$28 sps:$4 sm:$0xff]  }
 0x4c6   : > { %2981 = vmatpush1.bf16.msra.mxu1 %v4608_v1 }
 0x4c7   : > { %2982 = vmatprep.subr.bf16.mxu1 %v4615_v3  ;;  %v4643_v3 = vld [vmem:[%s6051_s7 + $0x15c] ss:$28 sps:$4 sm:$0xff]  }
 0x4ca   : > { %2983 = vmatpush1.bf16.msra.mxu1 %v4613_v4 }
 0x4cb   : > { %2984 = vmatprep.subr.bf16.mxu1 %v4620_v7 }
 0x4ce   : > { %2985 = vmatpush1.bf16.msra.mxu1 %v4618_v8  ;;  %v4641_v8 = vld [vmem:[%s6051_s7 + $0x158] ss:$28 sps:$4 sm:$0xff]  }
 0x4cf   : > { %3027 = vmatprep.subr.bf16.mxu1 %v4625_v11  ;;  %v4649_v11 = vld [vmem:[%s6051_s7 + $0x1cc] ss:$28 sps:$4 sm:$0xff]  }
 0x564   : > { %v2151_v15 = vpop.f32.mrb[24].mxu1 }
 0x565   : > { %v2152_v16 = vadd.f32 %v2151_v15, %v5647_v13  ;;  %v2153_v17 = vpop.f32.mrb[25].mxu1 }
 0x566   : > { %v2154_v18 = vadd.f32 %v2153_v17, %v5650_v14  ;;  %v2155_v19 = vpop.f32.mrb[26].mxu1 }
 0x567   : > { %v2156_v22 = vadd.f32 %v2155_v19, %v5647_v13  ;;  %v2157_v26 = vpop.f32.mrb[27].mxu1  ;;  %v2190_v28 = vmax.f32 %v2152_v16, 0.0  ;;  %v4647_v19 = vld [vmem:[%s6051_s7 + $0x1c8] ss:$28 sps:$4 sm:$0xff]  }
 0x568   : > { %v2158_v27 = vadd.f32 %v2157_v26, %v5650_v14  ;;  %v2191_v30 = vmax.f32 %v2154_v18, 0.0 }
 0x569   : > { %v2192_v29 = vmax.f32 %v2156_v22, 0.0 }
 0x56a   : > { %v2193_v31 = vmax.f32 %v2158_v27, 0.0  ;;  %v4652_v27 = vld [vmem:[%s6051_s7 + $0x204] ss:$28 sps:$4 sm:$0xff]  }
 0x56b   : > { %v5656_v24 = vpack.c.bf16 %v2192_v29, %v2190_v28 }
 0x56c   : > { %v5658_v32 = vpack.c.bf16 %v2193_v31, %v2191_v30 }
 0x56e   : > { %2986 = vmatprep.mubr.bf16.mxu1 %v5658_v32  ;;  %3205 = vmatprep.mubr.bf16.mxu0 %v5658_v32 }
 0x56f   : > { %2987 = vmatmul.mubr.bf16.vlgmr.msra.gmra.mrb[40].mxu1 %v5656_v24  ;;  %3206 = vmatmul.mubr.bf16.vlgmr.msra.gmra.mrb[16].mxu0 %v5656_v24 }
 0x570   : > { %3028 = vmatpush1.bf16.msra.mxu1 %v4623_v33 }
 0x571   : > { %3029 = vmatprep.subr.bf16.mxu1 %v4628_v25  ;;  %v4650_v25 = vld [vmem:[%s6051_s7 + $0x200] ss:$28 sps:$4 sm:$0xff]  }
 0x573   : > { %v2161_v36 = vpop.f32.mrb[28].mxu1 }
 0x574   : > { %v2162_v39 = vadd.f32 %v2161_v36, %v5647_v13  ;;  %3030 = vmatpush1.bf16.msra.mxu1 %v4626_v34  ;;  %v2163_v40 = vpop.f32.mrb[29].mxu1  ;;  %v4658_v36 = vld [vmem:[%s6051_s7 + $0x274] ss:$28 sps:$4 sm:$0xff]  }
 0x575   : > { %v2164_v42 = vadd.f32 %v2163_v40, %v5650_v14  ;;  %v2165_v43 = vpop.f32.mrb[30].mxu1  ;;  %3031 = vmatprep.subr.bf16.mxu1 %v4631_v35  ;;  %v4655_v35 = vld [vmem:[%s6051_s7 + $0x23c] ss:$28 sps:$4 sm:$0xff]   ;;  %v4661_v40 = vld [vmem:[%s6051_s7 + $0x2ac] ss:$28 sps:$4 sm:$0xff]  }
 0x576   : > { %v2166_v46 = vadd.f32 %v2165_v43, %v5647_v13  ;;  %v2167_v47 = vpop.f32.mrb[31].mxu1  ;;  %v2194_v49 = vmax.f32 %v2162_v39, 0.0  ;;  %v4656_v39 = vld [vmem:[%s6051_s7 + $0x270] ss:$28 sps:$4 sm:$0xff]   ;;  %v4662_v43 = vld [vmem:[%s6051_s7 + $0x2e0] ss:$28 sps:$4 sm:$0xff]  }
 0x577   : > { %v2168_v48 = vadd.f32 %v2167_v47, %v5650_v14  ;;  %v2195_v58 = vmax.f32 %v2164_v42, 0.0  ;;  %v4664_v42 = vld [vmem:[%s6051_s7 + $0x2e4] ss:$28 sps:$4 sm:$0xff]   ;;  %v4670_v47 = vld [vmem:[%s6051_s7 + $0x354] ss:$28 sps:$4 sm:$0xff]  }
 0x578   : > { %v2196_v50 = vmax.f32 %v2166_v46, 0.0  ;;  %3032 = vmatpush1.bf16.msra.mxu1 %v4629_v41  ;;  %v4659_v41 = vld [vmem:[%s6051_s7 + $0x2a8] ss:$28 sps:$4 sm:$0xff]   ;;  %v4665_v46 = vld [vmem:[%s6051_s7 + $0x318] ss:$28 sps:$4 sm:$0xff]  }
 0x579   : > { %v2197_v52 = vmax.f32 %v2168_v48, 0.0  ;;  %3033 = vmatprep.subr.bf16.mxu1 %v4634_v45  ;;  %v4667_v45 = vld [vmem:[%s6051_s7 + $0x31c] ss:$28 sps:$4 sm:$0xff]   ;;  %v4668_v48 = vld [vmem:[%s6051_s7 + $0x350] ss:$28 sps:$4 sm:$0xff]  }
 0x57a   : > { %v5689_v53 = vpack.c.bf16 %v2196_v50, %v2194_v49  ;;  %v4673_v49 = vld [vmem:[%s6051_s7 + $0x14] ss:$28 sps:$4 sm:$0xff]  }
 0x57b   : > { %v5694_v55 = vpack.c.bf16 %v2197_v52, %v2195_v58  ;;  %v4671_v50 = vld [vmem:[%s6051_s7 + $0x10] ss:$28 sps:$4 sm:$0xff]   ;;  %v4674_v58 = vld [vmem:[%s6051_s7 + $0x48] ss:$28 sps:$4 sm:$0xff]  }
 0x57c   : > { %3034 = vmatpush1.bf16.msra.mxu1 %v4632_v51  ;;  %v2171_v37 = vpop.f32.mrb[32].mxu1  ;;  %v4676_v51 = vld [vmem:[%s6051_s7 + $0x4c] ss:$28 sps:$4 sm:$0xff]   ;;  %v4679_v52 = vld [vmem:[%s6051_s7 + $0x84] ss:$28 sps:$4 sm:$0xff]  }
 0x57d   : > { %v2172_v56 = vadd.f32 %v2171_v37, %v5647_v13  ;;  %v2173_v57 = vpop.f32.mrb[33].mxu1  ;;  %2996 = vmatprep.mubr.bf16.mxu1 %v5694_v55  ;;  %3213 = vmatprep.mubr.bf16.mxu0 %v5694_v55  ;;  %v4682_v37 = vld [vmem:[%s6051_s7 + $0xbc] ss:$28 sps:$4 sm:$0xff]  }
 0x57e   : > { %v2174_v60 = vadd.f32 %v2173_v57, %v5650_v14  ;;  %v2175_v44 = vpop.f32.mrb[34].mxu1  ;;  %2997 = vmatmul.mubr.bf16.gmra.mrb[44].mxu1 %v5689_v53  ;;  %3035 = vmatprep.subr.bf16.mxu1 %v4637_v54  ;;  %v4677_v54 = vld [vmem:[%s6051_s7 + $0x80] ss:$28 sps:$4 sm:$0xff]   ;;  %v4683_v57 = vld [vmem:[%s6051_s7 + $0xf0] ss:$28 sps:$4 sm:$0xff]  }
 0x57f   : > { %v2176_v61 = vadd.f32 %v2175_v44, %v5647_v13  ;;  %3214 = vmatmul.mubr.bf16.gmra.mrb[20].mxu0 %v5689_v53  ;;  %v2177_v62 = vpop.f32.mrb[35].mxu1  ;;  %v2198_v1 = vmax.f32 %v2172_v56, 0.0  ;;  %v4685_v56 = vld [vmem:[%s6051_s7 + $0xf4] ss:$28 sps:$4 sm:$0xff]   ;;  %v4691_v44 = vld [vmem:[%s6051_s7 + $0x164] ss:$28 sps:$4 sm:$0xff]  }
 0x580   : > { %v2178_v63 = vadd.f32 %v2177_v62, %v5650_v14  ;;  %3036 = vmatpush1.bf16.msra.mxu1 %v4635_v38  ;;  %v2199_v4 = vmax.f32 %v2174_v60, 0.0  ;;  %v4680_v38 = vld [vmem:[%s6051_s7 + $0xb8] ss:$28 sps:$4 sm:$0xff]   ;;  %v4686_v60 = vld [vmem:[%s6051_s7 + $0x128] ss:$28 sps:$4 sm:$0xff]  }
 0x581   : > { %v2200_v2 = vmax.f32 %v2176_v61, 0.0  ;;  %3037 = vmatprep.subr.bf16.mxu1 %v4640_v59  ;;  %v4688_v59 = vld [vmem:[%s6051_s7 + $0x12c] ss:$28 sps:$4 sm:$0xff]   ;;  %v4689_v61 = vld [vmem:[%s6051_s7 + $0x160] ss:$28 sps:$4 sm:$0xff]  }
 0x582   : > { %v2201_v5 = vmax.f32 %v2178_v63, 0.0  ;;  %v4694_v62 = vld [vmem:[%s6051_s7 + $0x19c] ss:$28 sps:$4 sm:$0xff]  }
 0x583   : > { %v5716_v6 = vpack.c.bf16 %v2200_v2, %v2198_v1  ;;  %v4692_v63 = vld [vmem:[%s6051_s7 + $0x198] ss:$28 sps:$4 sm:$0xff]   ;;  %v4695_v1 = vld [vmem:[%s6051_s7 + $0x1d0] ss:$28 sps:$4 sm:$0xff]  }
 0x584   : > { %v5718_v7 = vpack.c.bf16 %v2201_v5, %v2199_v4  ;;  %3038 = vmatpush1.bf16.msra.mxu1 %v4638_v0  ;;  %v4697_v0 = vld [vmem:[%s6051_s7 + $0x1d4] ss:$28 sps:$4 sm:$0xff]   ;;  %v4700_v2 = vld [vmem:[%s6051_s7 + $0x20c] ss:$28 sps:$4 sm:$0xff]   ;;  %v4701_v4 = vld [vmem:[%s6051_s7 + $0x240] ss:$28 sps:$4 sm:$0xff]  }
 0x585   : > { %3039 = vmatprep.subr.bf16.mxu1 %v4643_v3  ;;  %v4703_v3 = vld [vmem:[%s6051_s7 + $0x244] ss:$28 sps:$4 sm:$0xff]   ;;  %v4706_v5 = vld [vmem:[%s6051_s7 + $0x27c] ss:$28 sps:$4 sm:$0xff]  }
 0x586   : > { %3006 = vmatprep.mubr.bf16.mxu1 %v5718_v7  ;;  %3221 = vmatprep.mubr.bf16.mxu0 %v5718_v7 }
 0x587   : > { %3007 = vmatmul.mubr.bf16.gmra.mrb[48].mxu1 %v5716_v6  ;;  %3222 = vmatmul.mubr.bf16.gmra.mrb[24].mxu0 %v5716_v6 }
 0x588   : > { %3040 = vmatpush1.bf16.msra.mxu1 %v4641_v8  ;;  %v4704_v8 = vld [vmem:[%s6051_s7 + $0x278] ss:$28 sps:$4 sm:$0xff]  }
 0x589   : > { %3041 = vmatprep.subr.bf16.mxu1 %v4646_v9  ;;  %v4709_v9 = vld [vmem:[%s6051_s7 + $0x2b4] ss:$28 sps:$4 sm:$0xff]  }
 0x58a   : > { %v2181_v12 = vpop.f32.mrb[36].mxu1 }
 0x58b   : > { %v2182_v15 = vadd.f32 %v2181_v12, %v5647_v13  ;;  %v2183_v16 = vpop.f32.mrb[37].mxu1  ;;  %v4710_v12 = vld [vmem:[%s6051_s7 + $0x2e8] ss:$28 sps:$4 sm:$0xff]  }
 0x58c   : > { %v2184_v17 = vadd.f32 %v2183_v16, %v5650_v14  ;;  %3042 = vmatpush1.bf16.msra.mxu1 %v4644_v10  ;;  %v2185_v18 = vpop.f32.mrb[38].mxu1  ;;  %v4707_v10 = vld [vmem:[%s6051_s7 + $0x2b0] ss:$28 sps:$4 sm:$0xff]   ;;  %v4713_v16 = vld [vmem:[%s6051_s7 + $0x320] ss:$28 sps:$4 sm:$0xff]  }
 0x58d   : > { %v2186_v22 = vadd.f32 %v2185_v18, %v5647_v13  ;;  %v2187_v26 = vpop.f32.mrb[39].mxu1  ;;  %3043 = vmatprep.subr.bf16.mxu1 %v4649_v11  ;;  %v2202_v29 = vmax.f32 %v2182_v15, 0.0  ;;  %v4712_v11 = vld [vmem:[%s6051_s7 + $0x2ec] ss:$28 sps:$4 sm:$0xff]   ;;  %v4715_v15 = vld [vmem:[%s6051_s7 + $0x324] ss:$28 sps:$4 sm:$0xff]  }
 0x58e   : > { %v2188_v28 = vadd.f32 %v2187_v26, %v5650_v14  ;;  %v2203_v31 = vmax.f32 %v2184_v17, 0.0  ;;  %v4653_v14 = vld [vmem:[%s6051_s7 + $0x238] ss:$28 sps:$4 sm:$0xff]  }
 0x58f   : > { %v2204_v30 = vmax.f32 %v2186_v22, 0.0  ;;  %v4718_v17 = vld [vmem:[%s6051_s7 + $0x35c] ss:$28 sps:$4 sm:$0xff]   ;;  %v2369_v22 = vsub.s32 6, %v5313_v20 }
 0x590   : > { %v2205_v33 = vmax.f32 %v2188_v28, 0.0  ;;  %3044 = vmatpush1.bf16.msra.mxu1 %v4647_v19  ;;  %v4716_v18 = vld [vmem:[%s6051_s7 + $0x358] ss:$28 sps:$4 sm:$0xff]   ;;  %v5908_v19 = vld [vmem:[%s6052_s8 + $0x4] sm:$0x7f] }
 0x591   : > { %v5749_v34 = vpack.c.bf16 %v2204_v30, %v2202_v29  ;;  %3045 = vmatprep.subr.bf16.mxu1 %v4652_v27 }
 0x592   : > { %v5751_v13 = vpack.c.bf16 %v2205_v33, %v2203_v31 }
 0x594   : > { %3046 = vmatpush1.bf16.msra.mxu1 %v4650_v25  ;;  %3016 = vmatprep.mubr.bf16.mxu1 %v5751_v13 }
 0x595   : > { %3229 = vmatprep.mubr.bf16.mxu0 %v5751_v13  ;;  %3017 = vmatmul.mubr.bf16.gmra.mrb[52].mxu1 %v5749_v34 }
 0x596   : > { %3230 = vmatmul.mubr.bf16.gmra.mrb[28].mxu0 %v5749_v34  ;;  %3047 = vmatprep.subr.bf16.mxu1 %v4655_v35 }
 0x597   : > { %3059 = vmatprep.mubr.bf16.mxu1 %v5658_v32 }
 0x598   : > { %3048 = vmatpush1.bf16.msra.mxu1 %v4653_v14 }
 0x599   : > { %3049 = vmatprep.subr.bf16.mxu1 %v4658_v36 }
 0x59c   : > { %3050 = vmatpush1.bf16.msra.mxu1 %v4656_v39 }
 0x59d   : > { %3051 = vmatprep.subr.bf16.mxu1 %v4661_v40 }
 0x5a0   : > { %3052 = vmatpush1.bf16.msra.mxu1 %v4659_v41 }
 0x5a1   : > { %3053 = vmatprep.subr.bf16.mxu1 %v4664_v42 }
 0x5a4   : > { %3054 = vmatpush1.bf16.msra.mxu1 %v4662_v43 }
 0x5a5   : > { %3055 = vmatprep.subr.bf16.mxu1 %v4667_v45 }
 0x5a8   : > { %3056 = vmatpush1.bf16.msra.mxu1 %v4665_v46 }
 0x5a9   : > { %3057 = vmatprep.subr.bf16.mxu1 %v4670_v47 }
 0x5ac   : > { %3058 = vmatpush1.bf16.msra.mxu1 %v4668_v48 }
 0x5ad   : > { %3100 = vmatprep.subr.bf16.mxu1 %v4673_v49 }
 0x5af   : > { %3060 = vmatmul.mubr.bf16.vlgmr.msra.gmra.mrb[56].mxu1 %v5656_v24 }
 0x5b0   : > { %3069 = vmatprep.mubr.bf16.mxu1 %v5694_v55  ;;  %3101 = vmatpush1.bf16.msra.mxu1 %v4671_v50 }
 0x5b1   : > { %3102 = vmatprep.subr.bf16.mxu1 %v4676_v51 }
 0x5b4   : > { %3103 = vmatpush1.bf16.msra.mxu1 %v4674_v58 }
 0x5b5   : > { %3104 = vmatprep.subr.bf16.mxu1 %v4679_v52 }
 0x5b7   : > { %3070 = vmatmul.mubr.bf16.gmra.mrb[60].mxu1 %v5689_v53 }
 0x5b8   : > { %3079 = vmatprep.mubr.bf16.mxu1 %v5718_v7  ;;  %3105 = vmatpush1.bf16.msra.mxu1 %v4677_v54 }
 0x5b9   : > { %3106 = vmatprep.subr.bf16.mxu1 %v4682_v37 }
 0x5bc   : > { %3107 = vmatpush1.bf16.msra.mxu1 %v4680_v38 }
 0x5bd   : > { %3108 = vmatprep.subr.bf16.mxu1 %v4685_v56 }
 0x5bf   : > { %3080 = vmatmul.mubr.bf16.gmra.mrb[64].mxu1 %v5716_v6 }
 0x5c0   : > { %3089 = vmatprep.mubr.bf16.mxu1 %v5751_v13  ;;  %3109 = vmatpush1.bf16.msra.mxu1 %v4683_v57 }
 0x5c1   : > { %3110 = vmatprep.subr.bf16.mxu1 %v4688_v59 }
 0x5c4   : > { %3111 = vmatpush1.bf16.msra.mxu1 %v4686_v60 }
 0x5c5   : > { %3112 = vmatprep.subr.bf16.mxu1 %v4691_v44 }
 0x5c7   : > { %3090 = vmatmul.mubr.bf16.gmra.mrb[68].mxu1 %v5749_v34 }
 0x5c8   : > { %3113 = vmatpush1.bf16.msra.mxu1 %v4689_v61  ;;  %3132 = vmatprep.mubr.bf16.mxu1 %v5658_v32  ;;  %v4698_v32 = vld [vmem:[%s6051_s7 + $0x208] ss:$28 sps:$4 sm:$0xff]  }
 0x5c9   : > { %3114 = vmatprep.subr.bf16.mxu1 %v4694_v62 }
 0x5cc   : > { %3115 = vmatpush1.bf16.msra.mxu1 %v4692_v63 }
 0x5cd   : > { %3116 = vmatprep.subr.bf16.mxu1 %v4697_v0 }
 0x5d0   : > { %3117 = vmatpush1.bf16.msra.mxu1 %v4695_v1 }
 0x5d1   : > { %3118 = vmatprep.subr.bf16.mxu1 %v4700_v2 }
 0x5d4   : > { %3119 = vmatpush1.bf16.msra.mxu1 %v4698_v32 }
 0x5d5   : > { %3120 = vmatprep.subr.bf16.mxu1 %v4703_v3 }
 0x5d8   : > { %3121 = vmatpush1.bf16.msra.mxu1 %v4701_v4 }
 0x5d9   : > { %3122 = vmatprep.subr.bf16.mxu1 %v4706_v5 }
 0x5dc   : > { %3123 = vmatpush1.bf16.msra.mxu1 %v4704_v8 }
 0x5dd   : > { %3124 = vmatprep.subr.bf16.mxu1 %v4709_v9 }
 0x5e0   : > { %3125 = vmatpush1.bf16.msra.mxu1 %v4707_v10 }
 0x5e1   : > { %3126 = vmatprep.subr.bf16.mxu1 %v4712_v11 }
 0x5e4   : > { %3127 = vmatpush1.bf16.msra.mxu1 %v4710_v12 }
 0x5e5   : > { %3128 = vmatprep.subr.bf16.mxu1 %v4715_v15 }
 0x5e8   : > { %3129 = vmatpush1.bf16.msra.mxu1 %v4713_v16 }
 0x5e9   : > { %3130 = vmatprep.subr.bf16.mxu1 %v4718_v17 }
 0x5ec   : > { %3131 = vmatpush1.bf16.msra.mxu1 %v4716_v18 }
 0x5ef   : > { %3133 = vmatmul.mubr.bf16.vlgmr.msra.gmra.mrb[72].mxu1 %v5656_v24  ;;  %v5913_v24 = vrot.slane %v5908_v19, %v5316_v21 }
 0x5f0   : > { %3142 = vmatprep.mubr.bf16.mxu1 %v5694_v55 }
 0x5f7   : > { %3143 = vmatmul.mubr.bf16.gmra.mrb[76].mxu1 %v5689_v53  ;;  %v5917_v53 = vrot.slane %v5908_v19, %v5322_v23 }
 0x5f8   : > { %3152 = vmatprep.mubr.bf16.mxu1 %v5718_v7  ;;  %v5920_v7 = vrot.slane %v5908_v19, %v2369_v22 }
 0x5ff   : > { %3153 = vmatmul.mubr.bf16.gmra.mrb[80].mxu1 %v5716_v6 }
 0x600   : > { %3162 = vmatprep.mubr.bf16.mxu1 %v5751_v13 }
 0x607   : > { %3163 = vmatmul.mubr.bf16.gmra.mrb[84].mxu1 %v5749_v34 }
 0x642   : > { %v2988_v55 = vpop.f32.mrb[40].mxu1  ;;  %v4210_v6 = vpop.f32.mrb[16].mxu0 }
 0x643   : > { %v2989_v26 = vadd.f32 %v2988_v55, %v5913_v24  ;;  %v2990_v27 = vpop.f32.mrb[41].mxu1  ;;  %v4211_v28 = vpop.f32.mrb[17].mxu0 }
 0x644   : > { %v2991_v29 = vadd.f32 %v2990_v27, %v5917_v53  ;;  %v4212_v30 = vadd.f32 %v4211_v28, %v4210_v6  ;;  %v2992_v31 = vpop.f32.mrb[42].mxu1  ;;  %v4213_v33 = vpop.f32.mrb[18].mxu0 }
 0x645   : > { %v3238_v21 = vmul.f32 0.5, %v2989_v26  ;;  %v2993_v25 = vadd.f32 %v2992_v31, %v5913_v24  ;;  %v2994_v34 = vpop.f32.mrb[43].mxu1  ;;  %v4214_v23 = vpop.f32.mrb[19].mxu0 }
 0x646   : > { %v3239_v13 = vmul.f32 0.5, %v2991_v29  ;;  %v3208_v35 = vadd.f32 %v4212_v30, %v5920_v7  ;;  %v2995_v14 = vadd.f32 %v2994_v34, %v5917_v53  ;;  %v4215_v36 = vadd.f32 %v4214_v23, %v4213_v33 }
 0x647   : > { %4735 = vtanh.f32 %v3238_v21  ;;  %v3245_v39 = vmul.f32 0.5, %v2993_v25 }
 0x648   : > { %4737 = vtanh.f32 %v3239_v13  ;;  %v3244_v40 = vmul.f32 0.5, %v3208_v35  ;;  %v3246_v41 = vmul.f32 0.5, %v2995_v14  ;;  %v3211_v42 = vadd.f32 %v4215_v36, %v5920_v7 }
 0x649   : > { %4739 = vtanh.f32 %v3245_v39 }
 0x64a   : > { %4741 = vtanh.f32 %v3244_v40  ;;  %v3251_v43 = vmul.f32 0.5, %v3211_v42 }
 0x64b   : > { %4743 = vtanh.f32 %v3246_v41 }
 0x64c   : > { %4745 = vtanh.f32 %v3251_v43 }
 0x651   : > { %v4736_v45 = vpop.eup %4735  ;;  %v2998_v46 = vpop.f32.mrb[44].mxu1 }
 0x652   : > { %v4738_v47 = vpop.eup %4737  ;;  %v3350_v48 = vmul.f32 0.5, %v4736_v45  ;;  %v2999_v49 = vadd.f32 %v2998_v46, %v5913_v24  ;;  %v4216_v50 = vpop.f32.mrb[20].mxu0 }
 0x653   : > { %v3000_v51 = vpop.f32.mrb[45].mxu1  ;;  %v4740_v58 = vpop.eup %4739  ;;  %v3351_v52 = vmul.f32 0.5, %v4738_v47 }
 0x654   : > { %v3001_v54 = vadd.f32 %v3000_v51, %v5917_v53  ;;  %v4217_v37 = vpop.f32.mrb[21].mxu0  ;;  %v3002_v38 = vpop.f32.mrb[46].mxu1  ;;  %v3406_v57 = vadd.f32 0.5, %v3350_v48  ;;  %v3357_v59 = vmul.f32 0.5, %v4740_v58  ;;  %v3252_v60 = vmul.f32 0.5, %v2999_v49 }
 0x655   : > { %v4742_v56 = vpop.eup %4741  ;;  %v4218_v44 = vadd.f32 %v4217_v37, %v4216_v50  ;;  %v4219_v61 = vpop.f32.mrb[22].mxu0  ;;  %v3407_v0 = vadd.f32 0.5, %v3351_v52  ;;  %v3003_v32 = vadd.f32 %v3002_v38, %v5913_v24 }
 0x656   : > { %v3004_v62 = vpop.f32.mrb[47].mxu1  ;;  %v4744_v63 = vpop.eup %4743  ;;  %v3356_v1 = vmul.f32 0.5, %v4742_v56  ;;  %v3253_v2 = vmul.f32 0.5, %v3001_v54  ;;  %v3413_v5 = vadd.f32 0.5, %v3357_v59  ;;  %4747 = vtanh.f32 %v3252_v60 }
 0x657   : > { %v4220_v3 = vpop.f32.mrb[23].mxu0  ;;  %v4746_v4 = vpop.eup %4745  ;;  %v3358_v8 = vmul.f32 0.5, %v4744_v63  ;;  %v3216_v9 = vadd.f32 %v4218_v44, %v5920_v7  ;;  %v4110_v10 = vpack.c.bf16 %v3407_v0, %v3406_v57  ;;  %v3259_v17 = vmul.f32 0.5, %v3003_v32 }
 0x658   : > { %v3412_v11 = vadd.f32 0.5, %v3356_v1  ;;  %v3363_v12 = vmul.f32 0.5, %v4746_v4  ;;  %4749 = vtanh.f32 %v3253_v2  ;;  %v3005_v18 = vadd.f32 %v3004_v62, %v5917_v53 }
 0x659   : > { %v3414_v15 = vadd.f32 0.5, %v3358_v8  ;;  %v3258_v16 = vmul.f32 0.5, %v3216_v9  ;;  %3638 = vst [vmem:[%s5936_s12] sm:$0xff] %v4110_v10  ;;  %v4221_v6 = vadd.f32 %v4220_v3, %v4219_v61 }
 0x65a   : > { %v4113_v22 = vpack.c.bf16 %v3412_v11, %v3412_v11  ;;  %v3419_v55 = vadd.f32 0.5, %v3363_v12  ;;  %v3260_v27 = vmul.f32 0.5, %v3005_v18  ;;  %v3008_v28 = vpop.f32.mrb[48].mxu1  ;;  %v4222_v29 = vpop.f32.mrb[24].mxu0 }
 0x65b   : > { %v4114_v26 = vpack.c.bf16 %v3414_v15, %v3413_v5  ;;  %4751 = vtanh.f32 %v3258_v16  ;;  %v3219_v31 = vadd.f32 %v4221_v6, %v5920_v7  ;;  %v3009_v33 = vadd.f32 %v3008_v28, %v5913_v24  ;;  %v3010_v21 = vpop.f32.mrb[49].mxu1  ;;  %v4223_v25 = vpop.f32.mrb[25].mxu0 }
 0x65c   : > { %3642 = vst.msk [vmem:[%s5936_s12 + $0x18] sm:$0xf] %vm3641_vm3, %v4113_v22  ;;  %v4117_v30 = vpack.c.bf16 %v3419_v55, %v3419_v55  ;;  %4753 = vtanh.f32 %v3259_v17  ;;  %v3011_v34 = vadd.f32 %v3010_v21, %v5917_v53  ;;  %v4224_v23 = vadd.f32 %v4223_v25, %v4222_v29  ;;  %v3012_v13 = vpop.f32.mrb[50].mxu1  ;;  %v4225_v35 = vpop.f32.mrb[26].mxu0 }
 0x65d   : > { %3643 = vst [vmem:[%s5936_s12 + $0x1c] sm:$0xff] %v4114_v26  ;;  %4755 = vtanh.f32 %v3260_v27  ;;  %v3265_v14 = vmul.f32 0.5, %v3219_v31  ;;  %v3266_v36 = vmul.f32 0.5, %v3009_v33  ;;  %v3013_v39 = vadd.f32 %v3012_v13, %v5913_v24  ;;  %v3014_v40 = vpop.f32.mrb[51].mxu1  ;;  %v4226_v41 = vpop.f32.mrb[27].mxu0 }
 0x65e   : > { %3646 = vst.msk [vmem:[%s5936_s12 + $0x34] sm:$0xf] %vm3641_vm3, %v4117_v30  ;;  %v3267_v42 = vmul.f32 0.5, %v3011_v34  ;;  %v3224_v43 = vadd.f32 %v4224_v23, %v5920_v7  ;;  %v3015_v45 = vadd.f32 %v3014_v40, %v5917_v53  ;;  %v4227_v46 = vadd.f32 %v4226_v41, %v4225_v35 }
 0x65f   : > { %4757 = vtanh.f32 %v3265_v14  ;;  %v3273_v47 = vmul.f32 0.5, %v3013_v39 }
 0x660   : > { %v4748_v48 = vpop.eup %4747  ;;  %4759 = vtanh.f32 %v3266_v36  ;;  %v3272_v49 = vmul.f32 0.5, %v3224_v43  ;;  %v3274_v50 = vmul.f32 0.5, %v3015_v45  ;;  %v3227_v51 = vadd.f32 %v4227_v46, %v5920_v7 }
 0x661   : > { %v3364_v52 = vmul.f32 0.5, %v4748_v48  ;;  %4761 = vtanh.f32 %v3267_v42 }
 0x662   : > { %v4750_v58 = vpop.eup %4749  ;;  %4763 = vtanh.f32 %v3272_v49  ;;  %v3279_v37 = vmul.f32 0.5, %v3227_v51 }
 0x663   : > { %v3365_v54 = vmul.f32 0.5, %v4750_v58  ;;  %v3420_v38 = vadd.f32 0.5, %v3364_v52  ;;  %4765 = vtanh.f32 %v3273_v47 }
 0x664   : > { %4767 = vtanh.f32 %v3274_v50 }
 0x665   : > { %v4752_v56 = vpop.eup %4751  ;;  %v3421_v57 = vadd.f32 0.5, %v3365_v54  ;;  %4769 = vtanh.f32 %v3279_v37 }
 0x666   : > { %v4754_v59 = vpop.eup %4753  ;;  %v3370_v60 = vmul.f32 0.5, %v4752_v56 }
 0x667   : > { %v4756_v44 = vpop.eup %4755  ;;  %v4118_v61 = vpack.c.bf16 %v3421_v57, %v3420_v38  ;;  %v3371_v62 = vmul.f32 0.5, %v4754_v59 }
 0x668   : > { %v3426_v63 = vadd.f32 0.5, %v3370_v60  ;;  %v3372_v0 = vmul.f32 0.5, %v4756_v44  ;;  %v3018_v2 = vpop.f32.mrb[52].mxu1 }
 0x669   : > { %3647 = vst [vmem:[%s5936_s12 + $0x38] sm:$0xff] %v4118_v61  ;;  %v3427_v1 = vadd.f32 0.5, %v3371_v62  ;;  %v4758_v32 = vpop.eup %4757  ;;  %v3019_v5 = vadd.f32 %v3018_v2, %v5913_v24  ;;  %v4228_v8 = vpop.f32.mrb[28].mxu0 }
 0x66a   : > { %v4121_v3 = vpack.c.bf16 %v3426_v63, %v3426_v63  ;;  %v3428_v4 = vadd.f32 0.5, %v3372_v0  ;;  %v3020_v9 = vpop.f32.mrb[53].mxu1  ;;  %v4760_v10 = vpop.eup %4759  ;;  %v3377_v11 = vmul.f32 0.5, %v4758_v32  ;;  %v2353_v63 = vsub.s32 2, %v5313_v20 }
 0x66b   : > { %v3021_v12 = vadd.f32 %v3020_v9, %v5917_v53  ;;  %v4229_v15 = vpop.f32.mrb[29].mxu0  ;;  %v3022_v16 = vpop.f32.mrb[54].mxu1  ;;  %v3378_v22 = vmul.f32 0.5, %v4760_v10  ;;  %v3280_v55 = vmul.f32 0.5, %v3019_v5 }
 0x66c   : > { %v4762_v17 = vpop.eup %4761  ;;  %3650 = vst.msk [vmem:[%s5936_s12 + $0x50] sm:$0xf] %vm3641_vm3, %v4121_v3  ;;  %v4122_v18 = vpack.c.bf16 %v3428_v4, %v3427_v1  ;;  %v4230_v6 = vadd.f32 %v4229_v15, %v4228_v8  ;;  %v4231_v26 = vpop.f32.mrb[30].mxu0  ;;  %v3433_v29 = vadd.f32 0.5, %v3377_v11  ;;  %v3023_v33 = vadd.f32 %v3022_v16, %v5913_v24 }
 0x66d   : > { %v3024_v27 = vpop.f32.mrb[55].mxu1  ;;  %v4764_v28 = vpop.eup %4763  ;;  %v3379_v30 = vmul.f32 0.5, %v4762_v17  ;;  %v3281_v31 = vmul.f32 0.5, %v3021_v12  ;;  %v3434_v34 = vadd.f32 0.5, %v3378_v22  ;;  %4771 = vtanh.f32 %v3280_v55 }
 0x66e   : > { %v4232_v21 = vpop.f32.mrb[31].mxu0  ;;  %v4766_v25 = vpop.eup %4765  ;;  %3651 = vst [vmem:[%s5936_s12 + $0x54] sm:$0xff] %v4122_v18  ;;  %v3384_v23 = vmul.f32 0.5, %v4764_v28  ;;  %v3232_v13 = vadd.f32 %v4230_v6, %v5920_v7  ;;  %v4125_v14 = vpack.c.bf16 %v3433_v29, %v3433_v29  ;;  %v3287_v43 = vmul.f32 0.5, %v3023_v33 }
 0x66f   : > { %v4768_v35 = vpop.eup %4767  ;;  %v3435_v36 = vadd.f32 0.5, %v3379_v30  ;;  %v3385_v39 = vmul.f32 0.5, %v4766_v25  ;;  %4773 = vtanh.f32 %v3281_v31  ;;  %v3025_v48 = vadd.f32 %v3024_v27, %v5917_v53 }
 0x670   : > { %v4770_v40 = vpop.eup %4769  ;;  %v3440_v41 = vadd.f32 0.5, %v3384_v23  ;;  %v3386_v42 = vmul.f32 0.5, %v4768_v35  ;;  %v3286_v24 = vmul.f32 0.5, %v3232_v13  ;;  %3654 = vst.msk [vmem:[%s5936_s12 + $0x6c] sm:$0xf] %vm3641_vm3, %v4125_v14  ;;  %v4233_v51 = vadd.f32 %v4232_v21, %v4231_v26 }
 0x671   : > { %v4126_v45 = vpack.c.bf16 %v3435_v36, %v3434_v34  ;;  %v3441_v46 = vadd.f32 0.5, %v3385_v39  ;;  %v3391_v47 = vmul.f32 0.5, %v4770_v40  ;;  %v3288_v52 = vmul.f32 0.5, %v3025_v48 }
 0x672   : > { %v4129_v49 = vpack.c.bf16 %v3440_v41, %v3440_v41  ;;  %v3442_v50 = vadd.f32 0.5, %v3386_v42  ;;  %4775 = vtanh.f32 %v3286_v24  ;;  %v3235_v37 = vadd.f32 %v4233_v51, %v5920_v7 }
 0x673   : > { %3655 = vst [vmem:[%s5936_s12 + $0x70] sm:$0xff] %v4126_v45  ;;  %v3447_v58 = vadd.f32 0.5, %v3391_v47  ;;  %4777 = vtanh.f32 %v3287_v43  ;;  %v2357_v1 = vsub.s32 3, %v5313_v20  ;;  %v5975_v9 = vrot.slane %v5908_v19, %v2353_v63 }
 0x674   : > { %3658 = vst.msk [vmem:[%s5936_s12 + $0x88] sm:$0xf] %vm3641_vm3, %v4129_v49  ;;  %v4130_v54 = vpack.c.bf16 %v3442_v50, %v3441_v46  ;;  %4779 = vtanh.f32 %v3288_v52  ;;  %v3293_v56 = vmul.f32 0.5, %v3235_v37 }
 0x675   : > { %v4133_v38 = vpack.c.bf16 %v3447_v58, %v3447_v58  ;;  %v5978_v11 = vrot.slane %v5908_v19, %v2357_v1 }
 0x676   : > { %3659 = vst [vmem:[%s5936_s12 + $0x8c] sm:$0xff] %v4130_v54  ;;  %4781 = vtanh.f32 %v3293_v56 }
 0x677   : > { %3662 = vst.msk [vmem:[%s5936_s12 + $0xa4] sm:$0xf] %vm3641_vm3, %v4133_v38  ;;  %v4772_v53 = vpop.eup %4771 }
 0x678   : > { %v3392_v59 = vmul.f32 0.5, %v4772_v53 }
 0x679   : > { %v4774_v57 = vpop.eup %4773 }
 0x67a   : > { %v3393_v60 = vmul.f32 0.5, %v4774_v57  ;;  %v3448_v44 = vadd.f32 0.5, %v3392_v59 }
 0x67c   : > { %v4776_v61 = vpop.eup %4775  ;;  %v3449_v62 = vadd.f32 0.5, %v3393_v60 }
 0x67d   : > { %v4778_v0 = vpop.eup %4777  ;;  %v3398_v7 = vmul.f32 0.5, %v4776_v61 }
 0x67e   : > { %v4134_v2 = vpack.c.bf16 %v3449_v62, %v3448_v44  ;;  %v3399_v32 = vmul.f32 0.5, %v4778_v0  ;;  %v4780_v3 = vpop.eup %4779 }
 0x67f   : > { %v3454_v4 = vadd.f32 0.5, %v3398_v7  ;;  %v3400_v8 = vmul.f32 0.5, %v4780_v3 }
 0x680   : > { %3663 = vst [vmem:[%s5936_s12 + $0xa8] sm:$0xff] %v4134_v2  ;;  %v3455_v5 = vadd.f32 0.5, %v3399_v32  ;;  %v4782_v12 = vpop.eup %4781 }
 0x681   : > { %v4137_v10 = vpack.c.bf16 %v3454_v4, %v3454_v4  ;;  %v3456_v15 = vadd.f32 0.5, %v3400_v8  ;;  %v3405_v16 = vmul.f32 0.5, %v4782_v12 }
 0x682   : > { %v3061_v17 = vpop.f32.mrb[56].mxu1 }
 0x683   : > { %3666 = vst.msk [vmem:[%s5936_s12 + $0xc0] sm:$0xf] %vm3641_vm3, %v4137_v10  ;;  %v4138_v18 = vpack.c.bf16 %v3456_v15, %v3455_v5  ;;  %v3062_v22 = vadd.f32 %v3061_v17, %v5975_v9  ;;  %v3063_v55 = vpop.f32.mrb[57].mxu1  ;;  %v3461_v6 = vadd.f32 0.5, %v3405_v16 }
 0x684   : > { %v3064_v26 = vadd.f32 %v3063_v55, %v5978_v11  ;;  %v3065_v27 = vpop.f32.mrb[58].mxu1 }
 0x685   : > { %3667 = vst [vmem:[%s5936_s12 + $0xc4] sm:$0xff] %v4138_v18  ;;  %v3240_v28 = vmul.f32 0.5, %v3062_v22  ;;  %v3066_v29 = vadd.f32 %v3065_v27, %v5975_v9  ;;  %v3067_v30 = vpop.f32.mrb[59].mxu1  ;;  %v4141_v31 = vpack.c.bf16 %v3461_v6, %v3461_v6 }
 0x686   : > { %v3241_v33 = vmul.f32 0.5, %v3064_v26  ;;  %v3068_v21 = vadd.f32 %v3067_v30, %v5978_v11 }
 0x687   : > { %4783 = vtanh.f32 %v3240_v28  ;;  %v3247_v25 = vmul.f32 0.5, %v3066_v29  ;;  %3670 = vst.msk [vmem:[%s5936_s12 + $0xdc] sm:$0xf] %vm3641_vm3, %v4141_v31 }
 0x688   : > { %4785 = vtanh.f32 %v3241_v33  ;;  %v3248_v34 = vmul.f32 0.5, %v3068_v21 }
 0x689   : > { %4787 = vtanh.f32 %v3247_v25 }
 0x68a   : > { %4789 = vtanh.f32 %v3248_v34  ;;  %v3071_v23 = vpop.f32.mrb[60].mxu1 }
 0x68b   : > { %v3072_v13 = vadd.f32 %v3071_v23, %v5975_v9  ;;  %v3073_v35 = vpop.f32.mrb[61].mxu1 }
 0x68c   : > { %v3074_v14 = vadd.f32 %v3073_v35, %v5978_v11  ;;  %v3075_v36 = vpop.f32.mrb[62].mxu1 }
 0x68d   : > { %v3254_v39 = vmul.f32 0.5, %v3072_v13  ;;  %v3076_v40 = vadd.f32 %v3075_v36, %v5975_v9  ;;  %v3077_v41 = vpop.f32.mrb[63].mxu1 }
 0x68e   : > { %v3255_v42 = vmul.f32 0.5, %v3074_v14  ;;  %v3078_v24 = vadd.f32 %v3077_v41, %v5978_v11 }
 0x68f   : > { %4791 = vtanh.f32 %v3254_v39  ;;  %v3261_v43 = vmul.f32 0.5, %v3076_v40 }
 0x690   : > { %4793 = vtanh.f32 %v3255_v42  ;;  %v3262_v45 = vmul.f32 0.5, %v3078_v24 }
 0x691   : > { %v4784_v46 = vpop.eup %4783  ;;  %4795 = vtanh.f32 %v3261_v43 }
 0x692   : > { %v4786_v47 = vpop.eup %4785  ;;  %v3352_v48 = vmul.f32 0.5, %v4784_v46  ;;  %4797 = vtanh.f32 %v3262_v45  ;;  %v3081_v49 = vpop.f32.mrb[64].mxu1 }
 0x693   : > { %v4788_v50 = vpop.eup %4787  ;;  %v3353_v51 = vmul.f32 0.5, %v4786_v47  ;;  %v3082_v58 = vadd.f32 %v3081_v49, %v5975_v9  ;;  %v3083_v52 = vpop.f32.mrb[65].mxu1 }
 0x694   : > { %v4790_v54 = vpop.eup %4789  ;;  %v3408_v37 = vadd.f32 0.5, %v3352_v48  ;;  %v3359_v38 = vmul.f32 0.5, %v4788_v50  ;;  %v3084_v56 = vadd.f32 %v3083_v52, %v5978_v11  ;;  %v3085_v53 = vpop.f32.mrb[66].mxu1 }
 0x695   : > { %v3409_v57 = vadd.f32 0.5, %v3353_v51  ;;  %v3360_v59 = vmul.f32 0.5, %v4790_v54  ;;  %v3268_v60 = vmul.f32 0.5, %v3082_v58  ;;  %v3086_v44 = vadd.f32 %v3085_v53, %v5975_v9  ;;  %v3087_v61 = vpop.f32.mrb[67].mxu1 }
 0x696   : > { %v3415_v62 = vadd.f32 0.5, %v3359_v38  ;;  %v3269_v63 = vmul.f32 0.5, %v3084_v56  ;;  %v3088_v0 = vadd.f32 %v3087_v61, %v5978_v11 }
 0x697   : > { %v4111_v7 = vpack.c.bf16 %v3409_v57, %v3408_v37  ;;  %v3416_v1 = vadd.f32 0.5, %v3360_v59  ;;  %4799 = vtanh.f32 %v3268_v60  ;;  %v3275_v2 = vmul.f32 0.5, %v3086_v44 }
 0x698   : > { %4801 = vtanh.f32 %v3269_v63  ;;  %v3276_v32 = vmul.f32 0.5, %v3088_v0  ;;  %v2365_v63 = vsub.s32 5, %v5313_v20 }
 0x699   : > { %v4792_v3 = vpop.eup %4791  ;;  %3639 = vst [vmem:[%s5936_s12 + $0x8] sm:$0xff] %v4111_v7  ;;  %v4115_v4 = vpack.c.bf16 %v3416_v1, %v3415_v62  ;;  %4803 = vtanh.f32 %v3275_v2  ;;  %v2361_v62 = vsub.s32 4, %v5313_v20 }
 0x69a   : > { %v4794_v5 = vpop.eup %4793  ;;  %v3366_v8 = vmul.f32 0.5, %v4792_v3  ;;  %4805 = vtanh.f32 %v3276_v32  ;;  %v3091_v10 = vpop.f32.mrb[68].mxu1  ;;  %v6015_v7 = vrot.slane %v5908_v19, %v2365_v63 }
 0x69b   : > { %v4796_v12 = vpop.eup %4795  ;;  %3644 = vst [vmem:[%s5936_s12 + $0x24] sm:$0xff] %v4115_v4  ;;  %v3367_v15 = vmul.f32 0.5, %v4794_v5  ;;  %v3092_v16 = vadd.f32 %v3091_v10, %v5975_v9  ;;  %v3093_v17 = vpop.f32.mrb[69].mxu1  ;;  %v6012_v0 = vrot.slane %v5908_v19, %v2361_v62 }
 0x69c   : > { %v4798_v18 = vpop.eup %4797  ;;  %v3422_v22 = vadd.f32 0.5, %v3366_v8  ;;  %v3373_v55 = vmul.f32 0.5, %v4796_v12  ;;  %v3094_v6 = vadd.f32 %v3093_v17, %v5978_v11  ;;  %v3095_v26 = vpop.f32.mrb[70].mxu1 }
 0x69d   : > { %v3423_v27 = vadd.f32 0.5, %v3367_v15  ;;  %v3374_v28 = vmul.f32 0.5, %v4798_v18  ;;  %v3282_v29 = vmul.f32 0.5, %v3092_v16  ;;  %v3096_v30 = vadd.f32 %v3095_v26, %v5975_v9  ;;  %v3097_v31 = vpop.f32.mrb[71].mxu1 }
 0x69e   : > { %v3429_v33 = vadd.f32 0.5, %v3373_v55  ;;  %v3283_v21 = vmul.f32 0.5, %v3094_v6  ;;  %v3098_v25 = vadd.f32 %v3097_v31, %v5978_v11 }
 0x69f   : > { %v4119_v34 = vpack.c.bf16 %v3423_v27, %v3422_v22  ;;  %v3430_v23 = vadd.f32 0.5, %v3374_v28  ;;  %4807 = vtanh.f32 %v3282_v29  ;;  %v3289_v13 = vmul.f32 0.5, %v3096_v30 }
 0x6a0   : > { %4809 = vtanh.f32 %v3283_v21  ;;  %v3290_v35 = vmul.f32 0.5, %v3098_v25 }
 0x6a1   : > { %v4800_v14 = vpop.eup %4799  ;;  %3648 = vst [vmem:[%s5936_s12 + $0x40] sm:$0xff] %v4119_v34  ;;  %v4123_v36 = vpack.c.bf16 %v3430_v23, %v3429_v33  ;;  %4811 = vtanh.f32 %v3289_v13 }
 0x6a2   : > { %v4802_v39 = vpop.eup %4801  ;;  %v3380_v40 = vmul.f32 0.5, %v4800_v14  ;;  %4813 = vtanh.f32 %v3290_v35 }
 0x6a3   : > { %v4804_v9 = vpop.eup %4803  ;;  %3652 = vst [vmem:[%s5936_s12 + $0x5c] sm:$0xff] %v4123_v36  ;;  %v3381_v41 = vmul.f32 0.5, %v4802_v39 }
 0x6a4   : > { %v4806_v42 = vpop.eup %4805  ;;  %v3436_v11 = vadd.f32 0.5, %v3380_v40  ;;  %v3387_v24 = vmul.f32 0.5, %v4804_v9 }
 0x6a5   : > { %v3437_v43 = vadd.f32 0.5, %v3381_v41  ;;  %v3388_v45 = vmul.f32 0.5, %v4806_v42 }
 0x6a6   : > { %v3443_v46 = vadd.f32 0.5, %v3387_v24 }
 0x6a7   : > { %v4127_v47 = vpack.c.bf16 %v3437_v43, %v3436_v11  ;;  %v3444_v48 = vadd.f32 0.5, %v3388_v45 }
 0x6a9   : > { %v4808_v49 = vpop.eup %4807  ;;  %3656 = vst [vmem:[%s5936_s12 + $0x78] sm:$0xff] %v4127_v47  ;;  %v4131_v50 = vpack.c.bf16 %v3444_v48, %v3443_v46 }
 0x6aa   : > { %v4810_v51 = vpop.eup %4809  ;;  %v3394_v58 = vmul.f32 0.5, %v4808_v49 }
 0x6ab   : > { %v4812_v52 = vpop.eup %4811  ;;  %3660 = vst [vmem:[%s5936_s12 + $0x94] sm:$0xff] %v4131_v50  ;;  %v3395_v54 = vmul.f32 0.5, %v4810_v51 }
 0x6ac   : > { %v4814_v37 = vpop.eup %4813  ;;  %v3450_v38 = vadd.f32 0.5, %v3394_v58  ;;  %v3401_v56 = vmul.f32 0.5, %v4812_v52 }
 0x6ad   : > { %v3451_v53 = vadd.f32 0.5, %v3395_v54  ;;  %v3402_v57 = vmul.f32 0.5, %v4814_v37 }
 0x6ae   : > { %v3457_v59 = vadd.f32 0.5, %v3401_v56 }
 0x6af   : > { %v4135_v60 = vpack.c.bf16 %v3451_v53, %v3450_v38  ;;  %v3458_v44 = vadd.f32 0.5, %v3402_v57 }
 0x6b1   : > { %3664 = vst [vmem:[%s5936_s12 + $0xb0] sm:$0xff] %v4135_v60  ;;  %v4139_v61 = vpack.c.bf16 %v3458_v44, %v3457_v59 }
 0x6b3   : > { %3668 = vst [vmem:[%s5936_s12 + $0xcc] sm:$0xff] %v4139_v61 }
 0x6c2   : > { %v3134_v1 = vpop.f32.mrb[72].mxu1 }
 0x6c3   : > { %v3135_v2 = vadd.f32 %v3134_v1, %v6012_v0  ;;  %v3136_v32 = vpop.f32.mrb[73].mxu1 }
 0x6c4   : > { %v3137_v3 = vadd.f32 %v3136_v32, %v6015_v7  ;;  %v3138_v4 = vpop.f32.mrb[74].mxu1 }
 0x6c5   : > { %v3242_v5 = vmul.f32 0.5, %v3135_v2  ;;  %v3139_v8 = vadd.f32 %v3138_v4, %v6012_v0  ;;  %v3140_v10 = vpop.f32.mrb[75].mxu1 }
 0x6c6   : > { %v3243_v12 = vmul.f32 0.5, %v3137_v3  ;;  %v3141_v20 = vadd.f32 %v3140_v10, %v6015_v7 }
 0x6c7   : > { %4815 = vtanh.f32 %v3242_v5  ;;  %v3249_v15 = vmul.f32 0.5, %v3139_v8 }
 0x6c8   : > { %4817 = vtanh.f32 %v3243_v12  ;;  %v3250_v16 = vmul.f32 0.5, %v3141_v20 }
 0x6c9   : > { %4819 = vtanh.f32 %v3249_v15 }
 0x6ca   : > { %4821 = vtanh.f32 %v3250_v16  ;;  %v3144_v19 = vpop.f32.mrb[76].mxu1 }
 0x6cb   : > { %v3145_v17 = vadd.f32 %v3144_v19, %v6012_v0  ;;  %v3146_v18 = vpop.f32.mrb[77].mxu1 }
 0x6cc   : > { %v3147_v22 = vadd.f32 %v3146_v18, %v6015_v7  ;;  %v3148_v55 = vpop.f32.mrb[78].mxu1 }
 0x6cd   : > { %v3256_v6 = vmul.f32 0.5, %v3145_v17  ;;  %v3149_v26 = vadd.f32 %v3148_v55, %v6012_v0  ;;  %v3150_v27 = vpop.f32.mrb[79].mxu1 }
 0x6ce   : > { %v3257_v28 = vmul.f32 0.5, %v3147_v22  ;;  %v3151_v29 = vadd.f32 %v3150_v27, %v6015_v7 }
 0x6cf   : > { %4823 = vtanh.f32 %v3256_v6  ;;  %v3263_v30 = vmul.f32 0.5, %v3149_v26 }
 0x6d0   : > { %4825 = vtanh.f32 %v3257_v28  ;;  %v3264_v31 = vmul.f32 0.5, %v3151_v29 }
 0x6d1   : > { %v4816_v33 = vpop.eup %4815  ;;  %4827 = vtanh.f32 %v3263_v30 }
 0x6d2   : > { %v4818_v21 = vpop.eup %4817  ;;  %v3354_v25 = vmul.f32 0.5, %v4816_v33  ;;  %4829 = vtanh.f32 %v3264_v31  ;;  %v3154_v34 = vpop.f32.mrb[80].mxu1 }
 0x6d3   : > { %v4820_v23 = vpop.eup %4819  ;;  %v3355_v13 = vmul.f32 0.5, %v4818_v21  ;;  %v3155_v35 = vadd.f32 %v3154_v34, %v6012_v0  ;;  %v3156_v14 = vpop.f32.mrb[81].mxu1 }
 0x6d4   : > { %v4822_v36 = vpop.eup %4821  ;;  %v3410_v39 = vadd.f32 0.5, %v3354_v25  ;;  %v3361_v40 = vmul.f32 0.5, %v4820_v23  ;;  %v3157_v9 = vadd.f32 %v3156_v14, %v6015_v7  ;;  %v3158_v41 = vpop.f32.mrb[82].mxu1 }
 0x6d5   : > { %v3411_v42 = vadd.f32 0.5, %v3355_v13  ;;  %v3362_v11 = vmul.f32 0.5, %v4822_v36  ;;  %v3270_v24 = vmul.f32 0.5, %v3155_v35  ;;  %v3159_v43 = vadd.f32 %v3158_v41, %v6012_v0  ;;  %v3160_v45 = vpop.f32.mrb[83].mxu1 }
 0x6d6   : > { %v3417_v46 = vadd.f32 0.5, %v3361_v40  ;;  %v3271_v47 = vmul.f32 0.5, %v3157_v9  ;;  %v3161_v48 = vadd.f32 %v3160_v45, %v6015_v7 }
 0x6d7   : > { %v4112_v49 = vpack.c.bf16 %v3411_v42, %v3410_v39  ;;  %v3418_v50 = vadd.f32 0.5, %v3362_v11  ;;  %4831 = vtanh.f32 %v3270_v24  ;;  %v3277_v51 = vmul.f32 0.5, %v3159_v43 }
 0x6d8   : > { %4833 = vtanh.f32 %v3271_v47  ;;  %v3278_v58 = vmul.f32 0.5, %v3161_v48 }
 0x6d9   : > { %v4824_v52 = vpop.eup %4823  ;;  %3640 = vst [vmem:[%s5936_s12 + $0x10] sm:$0xff] %v4112_v49  ;;  %v4116_v54 = vpack.c.bf16 %v3418_v50, %v3417_v46  ;;  %4835 = vtanh.f32 %v3277_v51 }
 0x6da   : > { %v4826_v37 = vpop.eup %4825  ;;  %v3368_v38 = vmul.f32 0.5, %v4824_v52  ;;  %4837 = vtanh.f32 %v3278_v58  ;;  %v3164_v56 = vpop.f32.mrb[84].mxu1 }
 0x6db   : > { %v4828_v53 = vpop.eup %4827  ;;  %3645 = vst [vmem:[%s5936_s12 + $0x2c] sm:$0xff] %v4116_v54  ;;  %v3369_v57 = vmul.f32 0.5, %v4826_v37  ;;  %v3165_v59 = vadd.f32 %v3164_v56, %v6012_v0  ;;  %v3166_v60 = vpop.f32.mrb[85].mxu1 }
 0x6dc   : > { %v4830_v44 = vpop.eup %4829  ;;  %v3424_v61 = vadd.f32 0.5, %v3368_v38  ;;  %v3375_v62 = vmul.f32 0.5, %v4828_v53  ;;  %v3167_v63 = vadd.f32 %v3166_v60, %v6015_v7  ;;  %v3168_v1 = vpop.f32.mrb[86].mxu1 }
 0x6dd   : > { %v3425_v2 = vadd.f32 0.5, %v3369_v57  ;;  %v3376_v32 = vmul.f32 0.5, %v4830_v44  ;;  %v3284_v3 = vmul.f32 0.5, %v3165_v59  ;;  %v3169_v4 = vadd.f32 %v3168_v1, %v6012_v0  ;;  %v3170_v5 = vpop.f32.mrb[87].mxu1 }
 0x6de   : > { %v3431_v8 = vadd.f32 0.5, %v3375_v62  ;;  %v3285_v10 = vmul.f32 0.5, %v3167_v63  ;;  %v3171_v12 = vadd.f32 %v3170_v5, %v6015_v7 }
 0x6df   : > { %v4120_v20 = vpack.c.bf16 %v3425_v2, %v3424_v61  ;;  %v3432_v15 = vadd.f32 0.5, %v3376_v32  ;;  %4839 = vtanh.f32 %v3284_v3  ;;  %v3291_v16 = vmul.f32 0.5, %v3169_v4 }
 0x6e0   : > { %4841 = vtanh.f32 %v3285_v10  ;;  %v3292_v19 = vmul.f32 0.5, %v3171_v12 }
 0x6e1   : > { %v4832_v17 = vpop.eup %4831  ;;  %3649 = vst [vmem:[%s5936_s12 + $0x48] sm:$0xff] %v4120_v20  ;;  %v4124_v18 = vpack.c.bf16 %v3432_v15, %v3431_v8  ;;  %4843 = vtanh.f32 %v3291_v16 }
 0x6e2   : > { %v4834_v22 = vpop.eup %4833  ;;  %v3382_v55 = vmul.f32 0.5, %v4832_v17  ;;  %4845 = vtanh.f32 %v3292_v19 }
 0x6e3   : > { %v4836_v0 = vpop.eup %4835  ;;  %3653 = vst [vmem:[%s5936_s12 + $0x64] sm:$0xff] %v4124_v18  ;;  %v3383_v6 = vmul.f32 0.5, %v4834_v22 }
 0x6e4   : > { %v4838_v26 = vpop.eup %4837  ;;  %v3438_v7 = vadd.f32 0.5, %v3382_v55  ;;  %v3389_v27 = vmul.f32 0.5, %v4836_v0 }
 0x6e5   : > { %v3439_v28 = vadd.f32 0.5, %v3383_v6  ;;  %v3390_v29 = vmul.f32 0.5, %v4838_v26 }
 0x6e6   : > { %v3445_v30 = vadd.f32 0.5, %v3389_v27 }
 0x6e7   : > { %v4128_v31 = vpack.c.bf16 %v3439_v28, %v3438_v7  ;;  %v3446_v33 = vadd.f32 0.5, %v3390_v29 }
 0x6e9   : > { %v4840_v21 = vpop.eup %4839  ;;  %3657 = vst [vmem:[%s5936_s12 + $0x80] sm:$0xff] %v4128_v31  ;;  %v4132_v25 = vpack.c.bf16 %v3446_v33, %v3445_v30 }
 0x6ea   : > { %v4842_v34 = vpop.eup %4841  ;;  %v3396_v23 = vmul.f32 0.5, %v4840_v21 }
 0x6eb   : > { %v4844_v13 = vpop.eup %4843  ;;  %3661 = vst [vmem:[%s5936_s12 + $0x9c] sm:$0xff] %v4132_v25  ;;  %v3397_v35 = vmul.f32 0.5, %v4842_v34 }
 0x6ec   : > { %v4846_v14 = vpop.eup %4845  ;;  %v3452_v36 = vadd.f32 0.5, %v3396_v23  ;;  %v3403_v39 = vmul.f32 0.5, %v4844_v13 }
 0x6ed   : > { %v3453_v40 = vadd.f32 0.5, %v3397_v35  ;;  %v3404_v9 = vmul.f32 0.5, %v4846_v14 }
 0x6ee   : > { %v3459_v41 = vadd.f32 0.5, %v3403_v39 }
 0x6ef   : > { %v4136_v42 = vpack.c.bf16 %v3453_v40, %v3452_v36  ;;  %v3460_v11 = vadd.f32 0.5, %v3404_v9 }
 0x6f1   : > { %3665 = vst [vmem:[%s5936_s12 + $0xb8] sm:$0xff] %v4136_v42  ;;  %v4140_v24 = vpack.c.bf16 %v3460_v11, %v3459_v41 }
 0x6f3   : > { %3669 = vst [vmem:[%s5936_s12 + $0xd4] sm:$0xff] %v4140_v24 }
 0x6f4 PF: > { %s21_s13 = sadd.s32 1, %s4853_s13  }
 0x6f5   : > { %p18_p4 = scmp.ge.s32.totalorder %s21_s13, 6  }
 0x6f7   :  { %20 = sbr.rel (!%p18_p4) target bundleno = 1 (0x1), region = 101 }

</bundles_post_ra>
